<compile_context>
chip_gen: v7x
topology: tpu7x:2x2x1
jax: 0.10.0
libtpu: 0.0.40
codegen_flags: <defaults>
</compile_context>

<pallas_src>
import jax
import jax.numpy as jnp
import numpy as np
from jax import lax
from jax.experimental import pallas as pl
from jax.experimental.pallas import tpu as pltpu

# ---- static model geometry (kernel_size = 6) ----
K1 = 6                   # conv1 kernel
P1 = K1 // 2             # conv1 padding = 3
K2 = K1 - 2              # conv2 kernel = 4
P2 = K2 // 2             # conv2 padding = 2
C_IN, C1, C2 = 3, 4, 8
L_IN = 1000              # implied by fc1 in_features = 8 * 250
LP2 = 250                # length after the second max-pool
FC_IN = C2 * LP2         # 2000

# polyphase layout constants
NPH = 4                  # number of input phases (stride 2 twice)
PHW = 256                # width of each phase slab (covers all needed taps)
QW = LP2 + 2             # 252: pool1 phases carried with conv2's zero padding
LEFT_PAD = P1 + NPH      # 7: conv1 pad (3) + one polyphase group shift (4)


def cnn_encoder_kernel(xph_ref, w1bd_ref, b1t_ref, w2bd_ref, b2t_ref,
                       wfct_ref, sum_ref, bfc_ref, out_ref):
    f32 = jnp.float32

    # Distinct shifted 4-phase input slices, keyed by s = phase_r + tap_k.
    # xs[s][row, v] = xpad2[row, 4*v + s]   (row = sample*C_IN + channel)
    xs = [xph_ref[s % NPH, :, (s // NPH):(s // NPH) + QW] for s in range(K1 + NPH - 1)]

    def conv1_phase(r):
        # raw conv1 output at positions 4*(v-1) + r, v in [0, QW)
        acc = jnp.dot(w1bd_ref[0], xs[r], preferred_element_type=f32)
        for k in range(1, K1):
            acc = acc + jnp.dot(w1bd_ref[k], xs[r + k], preferred_element_type=f32)
        return acc

    b1 = b1t_ref[...]                                   # (B*C1, 1)
    bc1 = b1.shape[0]
    col = lax.broadcasted_iota(jnp.int32, (bc1, QW), 1)
    edge = jnp.logical_or(col == 0, col == QW - 1)      # conv2 zero-pad columns

    # conv1 -> (+bias, ReLU commute with max) -> maxpool1, kept as the even/odd
    # phases of the zero-padded pool1 output (ready for conv2's taps).
    qe = jnp.where(edge, 0.0,
                   jnp.maximum(jnp.maximum(conv1_phase(0), conv1_phase(1)) + b1, 0.0))
    qo = jnp.where(edge, 0.0,
                   jnp.maximum(jnp.maximum(conv1_phase(2), conv1_phase(3)) + b1, 0.0))
    # TODO(synk): nn.Dropout(p=0.5) is treated as eval-mode identity (deterministic).

    def c2(k, src, off):
        return jnp.dot(w2bd_ref[k], src[:, off:off + LP2], preferred_element_type=f32)

    # conv2 polyphase: raw outputs at even / odd positions, then pool2 as a max.
    a2e = c2(0, qe, 0) + c2(1, qo, 0) + c2(2, qe, 1) + c2(3, qo, 1)
    a2o = c2(0, qo, 0) + c2(1, qe, 1) + c2(2, qo, 1) + c2(3, qe, 2)
    p2 = jnp.maximum(jnp.maximum(a2e, a2o) + b2t_ref[...], 0.0)      # (B*C2, 250)

    # fc1 (2000 -> 1) + sigmoid, batched over the block's samples.
    rowsum = jnp.sum(p2 * wfct_ref[...], axis=1, keepdims=True)      # (B*C2, 1)
    z = jnp.dot(sum_ref[...], rowsum, preferred_element_type=f32) + bfc_ref[0]
    ez = jnp.exp(-jnp.abs(z))                                        # stable sigmoid
    out_ref[...] = jnp.where(z >= 0.0, 1.0 / (1.0 + ez), ez / (1.0 + ez))


def cnn_encoder_forward(x, params, max_block=32):
    """x: (N, 3, 1000) float; returns (N, 1) sigmoid outputs."""
    n = x.shape[0]
    assert x.shape == (n, C_IN, L_IN)

    # Samples per grid step (B*C2 <= 256 keeps conv2 inside one MXU row tile).
    B = min(max_block, ((n + 7) // 8) * 8)
    n_pad = ((n + B - 1) // B) * B
    x32 = x.astype(jnp.float32)

    # Zero-pad batch to a multiple of B, and length to NPH*PHW with the conv1
    # padding plus one polyphase-group shift on the left.
    x_ext = jnp.pad(x32, ((0, n_pad - n), (0, 0),
                          (LEFT_PAD, NPH * PHW - L_IN - LEFT_PAD)))
    # 4-phase split done in XLA: xph[m, n*C_IN+i, u] = x_ext[n, i, 4u + m]
    xph = jnp.transpose(x_ext.reshape(n_pad, C_IN, PHW, NPH),
                        (3, 0, 1, 2)).reshape(NPH, n_pad * C_IN, PHW)

    # Block-diagonal per-tap weights fold the B samples onto MXU rows.
    eye_b = jnp.eye(B, dtype=jnp.float32)
    w1 = params["w1"].astype(jnp.float32)                 # (C1, C_IN, K1)
    w2 = params["w2"].astype(jnp.float32)                 # (C2, C1, K2)
    w1bd = jnp.stack([jnp.kron(eye_b, w1[:, :, k]) for k in range(K1)])  # (K1, B*C1, B*C_IN)
    w2bd = jnp.stack([jnp.kron(eye_b, w2[:, :, k]) for k in range(K2)])  # (K2, B*C2, B*C1)
    b1t = jnp.tile(params["b1"].reshape(C1, 1).astype(jnp.float32), (B, 1))
    b2t = jnp.tile(params["b2"].reshape(C2, 1).astype(jnp.float32), (B, 1))
    wfct = jnp.tile(params["wfc"].reshape(C2, LP2).astype(jnp.float32), (B, 1))
    # 0/1 matrix summing each sample's C2 rows: sumc[b, p*C2+o] = (p == b)
    sumc = (jnp.arange(B)[:, None] == (jnp.arange(B * C2)[None, :] // C2)
            ).astype(jnp.float32)
    bfc = params["bfc"].reshape(1).astype(jnp.float32)

    def const_spec(a):
        nd = a.ndim
        return pl.BlockSpec(a.shape, lambda b, _nd=nd: (0,) * _nd)

    grid_spec = pltpu.PrefetchScalarGridSpec(
        num_scalar_prefetch=0,
        grid=(n_pad // B,),
        in_specs=[
            pl.BlockSpec((NPH, B * C_IN, PHW), lambda b: (0, b, 0)),
            const_spec(w1bd), const_spec(b1t),
            const_spec(w2bd), const_spec(b2t),
            const_spec(wfct), const_spec(sumc),
            pl.BlockSpec(memory_space=pltpu.MemorySpace.SMEM),
        ],
        out_specs=pl.BlockSpec((B, 1), lambda b: (b, 0)),
    )

    out = pl.pallas_call(
        cnn_encoder_kernel,
        out_shape=jax.ShapeDtypeStruct((n_pad, 1), jnp.float32),
        grid_spec=grid_spec,
        compiler_params=pltpu.CompilerParams(
            dimension_semantics=("parallel",),
            vmem_limit_bytes=32 * 1024 * 1024),
    )(xph, w1bd, b1t, w2bd, b2t, wfct, sumc, bfc)
    return out[:n]


def reference_forward(x, params):
    """Pure-JAX (XLA) reference mirroring the PyTorch forward (eval mode)."""
    x = x.astype(jnp.float32)
    dn = ("NCH", "OIH", "NCH")
    y = lax.conv_general_dilated(x, params["w1"], (1,), [(P1, P1)],
                                 dimension_numbers=dn)
    y = jnp.maximum(y + params["b1"][None, :, None], 0.0)
    y = lax.reduce_window(y, -jnp.inf, lax.max, (1, 1, 2), (1, 1, 2), "VALID")
    y = lax.conv_general_dilated(y, params["w2"], (1,), [(P2, P2)],
                                 dimension_numbers=dn)
    y = jnp.maximum(y + params["b2"][None, :, None], 0.0)
    y = lax.reduce_window(y, -jnp.inf, lax.max, (1, 1, 2), (1, 1, 2), "VALID")
    y = y.reshape(x.shape[0], -1)                        # (N, 2000), c-major
    return jax.nn.sigmoid(y @ params["wfc"].T + params["bfc"][None, :])


if __name__ == "__main__":
    key = jax.random.PRNGKey(0)
    ks = jax.random.split(key, 7)
    params = dict(
        w1=0.2 * jax.random.normal(ks[0], (C1, C_IN, K1), jnp.float32),
        b1=0.1 * jax.random.normal(ks[1], (C1,), jnp.float32),
        w2=0.2 * jax.random.normal(ks[2], (C2, C1, K2), jnp.float32),
        b2=0.1 * jax.random.normal(ks[3], (C2,), jnp.float32),
        wfc=0.05 * jax.random.normal(ks[4], (1, FC_IN), jnp.float32),
        bfc=0.1 * jax.random.normal(ks[5], (1,), jnp.float32),
    )
    x = jax.random.normal(ks[6], (2, C_IN, L_IN), jnp.float32)

    out = jax.block_until_ready(cnn_encoder_forward(x, params))
    ref = jax.block_until_ready(reference_forward(x, params))

    assert out.shape == (2, 1)
    np.testing.assert_allclose(np.asarray(out), np.asarray(ref),
                               rtol=1e-3, atol=1e-4)
    print("KERNEL_OK")
</pallas_src>

<mosaic_0001>
module attributes {stable_mosaic.version = 11 : i64} {
  func.func @cnn_encoder_kernel(%arg0: i32, %arg1: memref<4x24x256xf32, #tpu.memory_space<vmem>>, %arg2: memref<6x32x24xf32, #tpu.memory_space<vmem>>, %arg3: memref<32x1xf32, #tpu.memory_space<vmem>>, %arg4: memref<4x64x32xf32, #tpu.memory_space<vmem>>, %arg5: memref<64x1xf32, #tpu.memory_space<vmem>>, %arg6: memref<64x250xf32, #tpu.memory_space<vmem>>, %arg7: memref<8x64xf32, #tpu.memory_space<vmem>>, %arg8: memref<1xf32, #tpu.memory_space<smem>>, %arg9: memref<8x1xf32, #tpu.memory_space<vmem>>) attributes {dimension_semantics = [#tpu.dimension_semantics<parallel>], iteration_bounds = array<i64: 1>, scalar_prefetch = 0 : i64, scratch_operands = 0 : i64, tpu.core_type = #tpu.core_type<tc>, window_params = [{transform_indices = @transform_0, window_bounds = array<i64: 4, 24, 256>}, {pipeline_mode = #tpu.pipeline_mode<synchronous>, transform_indices = @transform_1, window_bounds = array<i64: 6, 32, 24>}, {pipeline_mode = #tpu.pipeline_mode<synchronous>, transform_indices = @transform_2, window_bounds = array<i64: 32, 1>}, {pipeline_mode = #tpu.pipeline_mode<synchronous>, transform_indices = @transform_3, window_bounds = array<i64: 4, 64, 32>}, {pipeline_mode = #tpu.pipeline_mode<synchronous>, transform_indices = @transform_4, window_bounds = array<i64: 64, 1>}, {pipeline_mode = #tpu.pipeline_mode<synchronous>, transform_indices = @transform_5, window_bounds = array<i64: 64, 250>}, {pipeline_mode = #tpu.pipeline_mode<synchronous>, transform_indices = @transform_6, window_bounds = array<i64: 8, 64>}, {transform_indices = @transform_7, window_bounds = array<i64: 1>}, {transform_indices = @transform_8, window_bounds = array<i64: 8, 1>}]} {
    %c0 = arith.constant 0 : index
    %c0_0 = arith.constant 0 : index
    %c0_1 = arith.constant 0 : index
    %0 = vector.load %arg1[%c0, %c0_0, %c0_1] : memref<4x24x256xf32, #tpu.memory_space<vmem>>, vector<1x24x252xf32>
    %1 = vector.shape_cast %0 : vector<1x24x252xf32> to vector<24x252xf32>
    %c1 = arith.constant 1 : index
    %c0_2 = arith.constant 0 : index
    %c0_3 = arith.constant 0 : index
    %2 = vector.load %arg1[%c1, %c0_2, %c0_3] : memref<4x24x256xf32, #tpu.memory_space<vmem>>, vector<1x24x252xf32>
    %3 = vector.shape_cast %2 : vector<1x24x252xf32> to vector<24x252xf32>
    %c2 = arith.constant 2 : index
    %c0_4 = arith.constant 0 : index
    %c0_5 = arith.constant 0 : index
    %4 = vector.load %arg1[%c2, %c0_4, %c0_5] : memref<4x24x256xf32, #tpu.memory_space<vmem>>, vector<1x24x252xf32>
    %5 = vector.shape_cast %4 : vector<1x24x252xf32> to vector<24x252xf32>
    %c3 = arith.constant 3 : index
    %c0_6 = arith.constant 0 : index
    %c0_7 = arith.constant 0 : index
    %6 = vector.load %arg1[%c3, %c0_6, %c0_7] : memref<4x24x256xf32, #tpu.memory_space<vmem>>, vector<1x24x252xf32>
    %7 = vector.shape_cast %6 : vector<1x24x252xf32> to vector<24x252xf32>
    %c0_8 = arith.constant 0 : index
    %c0_9 = arith.constant 0 : index
    %c1_10 = arith.constant 1 : index
    %8 = vector.load %arg1[%c0_8, %c0_9, %c1_10] : memref<4x24x256xf32, #tpu.memory_space<vmem>>, vector<1x24x252xf32>
    %9 = vector.shape_cast %8 : vector<1x24x252xf32> to vector<24x252xf32>
    %c1_11 = arith.constant 1 : index
    %c0_12 = arith.constant 0 : index
    %c1_13 = arith.constant 1 : index
    %10 = vector.load %arg1[%c1_11, %c0_12, %c1_13] : memref<4x24x256xf32, #tpu.memory_space<vmem>>, vector<1x24x252xf32>
    %11 = vector.shape_cast %10 : vector<1x24x252xf32> to vector<24x252xf32>
    %c2_14 = arith.constant 2 : index
    %c0_15 = arith.constant 0 : index
    %c1_16 = arith.constant 1 : index
    %12 = vector.load %arg1[%c2_14, %c0_15, %c1_16] : memref<4x24x256xf32, #tpu.memory_space<vmem>>, vector<1x24x252xf32>
    %13 = vector.shape_cast %12 : vector<1x24x252xf32> to vector<24x252xf32>
    %c3_17 = arith.constant 3 : index
    %c0_18 = arith.constant 0 : index
    %c1_19 = arith.constant 1 : index
    %14 = vector.load %arg1[%c3_17, %c0_18, %c1_19] : memref<4x24x256xf32, #tpu.memory_space<vmem>>, vector<1x24x252xf32>
    %15 = vector.shape_cast %14 : vector<1x24x252xf32> to vector<24x252xf32>
    %c0_20 = arith.constant 0 : index
    %c0_21 = arith.constant 0 : index
    %c2_22 = arith.constant 2 : index
    %16 = vector.load %arg1[%c0_20, %c0_21, %c2_22] : memref<4x24x256xf32, #tpu.memory_space<vmem>>, vector<1x24x252xf32>
    %17 = vector.shape_cast %16 : vector<1x24x252xf32> to vector<24x252xf32>
    %c0_23 = arith.constant 0 : index
    %c0_24 = arith.constant 0 : index
    %18 = vector.load %arg3[%c0_23, %c0_24] : memref<32x1xf32, #tpu.memory_space<vmem>>, vector<32x1xf32>
    %19 = tpu.iota {dimensions = array<i32: 1>} : vector<32x252xi32>
    %c0_i32 = arith.constant 0 : i32
    %20 = vector.broadcast %c0_i32 : i32 to vector<32x252xi32>
    %21 = arith.cmpi eq, %19, %20 : vector<32x252xi32>
    %c251_i32 = arith.constant 251 : i32
    %22 = vector.broadcast %c251_i32 : i32 to vector<32x252xi32>
    %23 = arith.cmpi eq, %19, %22 : vector<32x252xi32>
    %24 = arith.ori %21, %23 : vector<32x252xi1>
    %c0_25 = arith.constant 0 : index
    %c0_26 = arith.constant 0 : index
    %c0_27 = arith.constant 0 : index
    %25 = vector.load %arg2[%c0_25, %c0_26, %c0_27] : memref<6x32x24xf32, #tpu.memory_space<vmem>>, vector<1x32x24xf32>
    %26 = vector.shape_cast %25 : vector<1x32x24xf32> to vector<32x24xf32>
    %cst = arith.constant dense<0.000000e+00> : vector<32x252xf32>
    %27 = tpu.matmul %26, %1, %cst {dimension_numbers = #tpu.dot_dimension_numbers<[1], [0], [0], [1], [0, 0, 1, 1], [], []>} : vector<32x24xf32>, vector<24x252xf32>, vector<32x252xf32> -> vector<32x252xf32>
    %c1_28 = arith.constant 1 : index
    %c0_29 = arith.constant 0 : index
    %c0_30 = arith.constant 0 : index
    %28 = vector.load %arg2[%c1_28, %c0_29, %c0_30] : memref<6x32x24xf32, #tpu.memory_space<vmem>>, vector<1x32x24xf32>
    %29 = vector.shape_cast %28 : vector<1x32x24xf32> to vector<32x24xf32>
    %cst_31 = arith.constant dense<0.000000e+00> : vector<32x252xf32>
    %30 = tpu.matmul %29, %3, %cst_31 {dimension_numbers = #tpu.dot_dimension_numbers<[1], [0], [0], [1], [0, 0, 1, 1], [], []>} : vector<32x24xf32>, vector<24x252xf32>, vector<32x252xf32> -> vector<32x252xf32>
    %31 = arith.addf %27, %30 : vector<32x252xf32>
    %c2_32 = arith.constant 2 : index
    %c0_33 = arith.constant 0 : index
    %c0_34 = arith.constant 0 : index
    %32 = vector.load %arg2[%c2_32, %c0_33, %c0_34] : memref<6x32x24xf32, #tpu.memory_space<vmem>>, vector<1x32x24xf32>
    %33 = vector.shape_cast %32 : vector<1x32x24xf32> to vector<32x24xf32>
    %cst_35 = arith.constant dense<0.000000e+00> : vector<32x252xf32>
    %34 = tpu.matmul %33, %5, %cst_35 {dimension_numbers = #tpu.dot_dimension_numbers<[1], [0], [0], [1], [0, 0, 1, 1], [], []>} : vector<32x24xf32>, vector<24x252xf32>, vector<32x252xf32> -> vector<32x252xf32>
    %35 = arith.addf %31, %34 : vector<32x252xf32>
    %c3_36 = arith.constant 3 : index
    %c0_37 = arith.constant 0 : index
    %c0_38 = arith.constant 0 : index
    %36 = vector.load %arg2[%c3_36, %c0_37, %c0_38] : memref<6x32x24xf32, #tpu.memory_space<vmem>>, vector<1x32x24xf32>
    %37 = vector.shape_cast %36 : vector<1x32x24xf32> to vector<32x24xf32>
    %cst_39 = arith.constant dense<0.000000e+00> : vector<32x252xf32>
    %38 = tpu.matmul %37, %7, %cst_39 {dimension_numbers = #tpu.dot_dimension_numbers<[1], [0], [0], [1], [0, 0, 1, 1], [], []>} : vector<32x24xf32>, vector<24x252xf32>, vector<32x252xf32> -> vector<32x252xf32>
    %39 = arith.addf %35, %38 : vector<32x252xf32>
    %c4 = arith.constant 4 : index
    %c0_40 = arith.constant 0 : index
    %c0_41 = arith.constant 0 : index
    %40 = vector.load %arg2[%c4, %c0_40, %c0_41] : memref<6x32x24xf32, #tpu.memory_space<vmem>>, vector<1x32x24xf32>
    %41 = vector.shape_cast %40 : vector<1x32x24xf32> to vector<32x24xf32>
    %cst_42 = arith.constant dense<0.000000e+00> : vector<32x252xf32>
    %42 = tpu.matmul %41, %9, %cst_42 {dimension_numbers = #tpu.dot_dimension_numbers<[1], [0], [0], [1], [0, 0, 1, 1], [], []>} : vector<32x24xf32>, vector<24x252xf32>, vector<32x252xf32> -> vector<32x252xf32>
    %43 = arith.addf %39, %42 : vector<32x252xf32>
    %c5 = arith.constant 5 : index
    %c0_43 = arith.constant 0 : index
    %c0_44 = arith.constant 0 : index
    %44 = vector.load %arg2[%c5, %c0_43, %c0_44] : memref<6x32x24xf32, #tpu.memory_space<vmem>>, vector<1x32x24xf32>
    %45 = vector.shape_cast %44 : vector<1x32x24xf32> to vector<32x24xf32>
    %cst_45 = arith.constant dense<0.000000e+00> : vector<32x252xf32>
    %46 = tpu.matmul %45, %11, %cst_45 {dimension_numbers = #tpu.dot_dimension_numbers<[1], [0], [0], [1], [0, 0, 1, 1], [], []>} : vector<32x24xf32>, vector<24x252xf32>, vector<32x252xf32> -> vector<32x252xf32>
    %47 = arith.addf %43, %46 : vector<32x252xf32>
    %c0_46 = arith.constant 0 : index
    %c0_47 = arith.constant 0 : index
    %c0_48 = arith.constant 0 : index
    %48 = vector.load %arg2[%c0_46, %c0_47, %c0_48] : memref<6x32x24xf32, #tpu.memory_space<vmem>>, vector<1x32x24xf32>
    %49 = vector.shape_cast %48 : vector<1x32x24xf32> to vector<32x24xf32>
    %cst_49 = arith.constant dense<0.000000e+00> : vector<32x252xf32>
    %50 = tpu.matmul %49, %3, %cst_49 {dimension_numbers = #tpu.dot_dimension_numbers<[1], [0], [0], [1], [0, 0, 1, 1], [], []>} : vector<32x24xf32>, vector<24x252xf32>, vector<32x252xf32> -> vector<32x252xf32>
    %c1_50 = arith.constant 1 : index
    %c0_51 = arith.constant 0 : index
    %c0_52 = arith.constant 0 : index
    %51 = vector.load %arg2[%c1_50, %c0_51, %c0_52] : memref<6x32x24xf32, #tpu.memory_space<vmem>>, vector<1x32x24xf32>
    %52 = vector.shape_cast %51 : vector<1x32x24xf32> to vector<32x24xf32>
    %cst_53 = arith.constant dense<0.000000e+00> : vector<32x252xf32>
    %53 = tpu.matmul %52, %5, %cst_53 {dimension_numbers = #tpu.dot_dimension_numbers<[1], [0], [0], [1], [0, 0, 1, 1], [], []>} : vector<32x24xf32>, vector<24x252xf32>, vector<32x252xf32> -> vector<32x252xf32>
    %54 = arith.addf %50, %53 : vector<32x252xf32>
    %c2_54 = arith.constant 2 : index
    %c0_55 = arith.constant 0 : index
    %c0_56 = arith.constant 0 : index
    %55 = vector.load %arg2[%c2_54, %c0_55, %c0_56] : memref<6x32x24xf32, #tpu.memory_space<vmem>>, vector<1x32x24xf32>
    %56 = vector.shape_cast %55 : vector<1x32x24xf32> to vector<32x24xf32>
    %cst_57 = arith.constant dense<0.000000e+00> : vector<32x252xf32>
    %57 = tpu.matmul %56, %7, %cst_57 {dimension_numbers = #tpu.dot_dimension_numbers<[1], [0], [0], [1], [0, 0, 1, 1], [], []>} : vector<32x24xf32>, vector<24x252xf32>, vector<32x252xf32> -> vector<32x252xf32>
    %58 = arith.addf %54, %57 : vector<32x252xf32>
    %c3_58 = arith.constant 3 : index
    %c0_59 = arith.constant 0 : index
    %c0_60 = arith.constant 0 : index
    %59 = vector.load %arg2[%c3_58, %c0_59, %c0_60] : memref<6x32x24xf32, #tpu.memory_space<vmem>>, vector<1x32x24xf32>
    %60 = vector.shape_cast %59 : vector<1x32x24xf32> to vector<32x24xf32>
    %cst_61 = arith.constant dense<0.000000e+00> : vector<32x252xf32>
    %61 = tpu.matmul %60, %9, %cst_61 {dimension_numbers = #tpu.dot_dimension_numbers<[1], [0], [0], [1], [0, 0, 1, 1], [], []>} : vector<32x24xf32>, vector<24x252xf32>, vector<32x252xf32> -> vector<32x252xf32>
    %62 = arith.addf %58, %61 : vector<32x252xf32>
    %c4_62 = arith.constant 4 : index
    %c0_63 = arith.constant 0 : index
    %c0_64 = arith.constant 0 : index
    %63 = vector.load %arg2[%c4_62, %c0_63, %c0_64] : memref<6x32x24xf32, #tpu.memory_space<vmem>>, vector<1x32x24xf32>
    %64 = vector.shape_cast %63 : vector<1x32x24xf32> to vector<32x24xf32>
    %cst_65 = arith.constant dense<0.000000e+00> : vector<32x252xf32>
    %65 = tpu.matmul %64, %11, %cst_65 {dimension_numbers = #tpu.dot_dimension_numbers<[1], [0], [0], [1], [0, 0, 1, 1], [], []>} : vector<32x24xf32>, vector<24x252xf32>, vector<32x252xf32> -> vector<32x252xf32>
    %66 = arith.addf %62, %65 : vector<32x252xf32>
    %c5_66 = arith.constant 5 : index
    %c0_67 = arith.constant 0 : index
    %c0_68 = arith.constant 0 : index
    %67 = vector.load %arg2[%c5_66, %c0_67, %c0_68] : memref<6x32x24xf32, #tpu.memory_space<vmem>>, vector<1x32x24xf32>
    %68 = vector.shape_cast %67 : vector<1x32x24xf32> to vector<32x24xf32>
    %cst_69 = arith.constant dense<0.000000e+00> : vector<32x252xf32>
    %69 = tpu.matmul %68, %13, %cst_69 {dimension_numbers = #tpu.dot_dimension_numbers<[1], [0], [0], [1], [0, 0, 1, 1], [], []>} : vector<32x24xf32>, vector<24x252xf32>, vector<32x252xf32> -> vector<32x252xf32>
    %70 = arith.addf %66, %69 : vector<32x252xf32>
    %71 = arith.maximumf %47, %70 : vector<32x252xf32>
    %72 = vector.broadcast %18 : vector<32x1xf32> to vector<32x252xf32>
    %73 = arith.addf %71, %72 : vector<32x252xf32>
    %cst_70 = arith.constant 0.000000e+00 : f32
    %74 = vector.broadcast %cst_70 : f32 to vector<32x252xf32>
    %75 = arith.maximumf %73, %74 : vector<32x252xf32>
    %cst_71 = arith.constant 0.000000e+00 : f32
    %76 = vector.broadcast %cst_71 : f32 to vector<32x252xf32>
    %77 = arith.select %24, %76, %75 : vector<32x252xi1>, vector<32x252xf32>
    %c0_72 = arith.constant 0 : index
    %c0_73 = arith.constant 0 : index
    %c0_74 = arith.constant 0 : index
    %78 = vector.load %arg2[%c0_72, %c0_73, %c0_74] : memref<6x32x24xf32, #tpu.memory_space<vmem>>, vector<1x32x24xf32>
    %79 = vector.shape_cast %78 : vector<1x32x24xf32> to vector<32x24xf32>
    %cst_75 = arith.constant dense<0.000000e+00> : vector<32x252xf32>
    %80 = tpu.matmul %79, %5, %cst_75 {dimension_numbers = #tpu.dot_dimension_numbers<[1], [0], [0], [1], [0, 0, 1, 1], [], []>} : vector<32x24xf32>, vector<24x252xf32>, vector<32x252xf32> -> vector<32x252xf32>
    %c1_76 = arith.constant 1 : index
    %c0_77 = arith.constant 0 : index
    %c0_78 = arith.constant 0 : index
    %81 = vector.load %arg2[%c1_76, %c0_77, %c0_78] : memref<6x32x24xf32, #tpu.memory_space<vmem>>, vector<1x32x24xf32>
    %82 = vector.shape_cast %81 : vector<1x32x24xf32> to vector<32x24xf32>
    %cst_79 = arith.constant dense<0.000000e+00> : vector<32x252xf32>
    %83 = tpu.matmul %82, %7, %cst_79 {dimension_numbers = #tpu.dot_dimension_numbers<[1], [0], [0], [1], [0, 0, 1, 1], [], []>} : vector<32x24xf32>, vector<24x252xf32>, vector<32x252xf32> -> vector<32x252xf32>
    %84 = arith.addf %80, %83 : vector<32x252xf32>
    %c2_80 = arith.constant 2 : index
    %c0_81 = arith.constant 0 : index
    %c0_82 = arith.constant 0 : index
    %85 = vector.load %arg2[%c2_80, %c0_81, %c0_82] : memref<6x32x24xf32, #tpu.memory_space<vmem>>, vector<1x32x24xf32>
    %86 = vector.shape_cast %85 : vector<1x32x24xf32> to vector<32x24xf32>
    %cst_83 = arith.constant dense<0.000000e+00> : vector<32x252xf32>
    %87 = tpu.matmul %86, %9, %cst_83 {dimension_numbers = #tpu.dot_dimension_numbers<[1], [0], [0], [1], [0, 0, 1, 1], [], []>} : vector<32x24xf32>, vector<24x252xf32>, vector<32x252xf32> -> vector<32x252xf32>
    %88 = arith.addf %84, %87 : vector<32x252xf32>
    %c3_84 = arith.constant 3 : index
    %c0_85 = arith.constant 0 : index
    %c0_86 = arith.constant 0 : index
    %89 = vector.load %arg2[%c3_84, %c0_85, %c0_86] : memref<6x32x24xf32, #tpu.memory_space<vmem>>, vector<1x32x24xf32>
    %90 = vector.shape_cast %89 : vector<1x32x24xf32> to vector<32x24xf32>
    %cst_87 = arith.constant dense<0.000000e+00> : vector<32x252xf32>
    %91 = tpu.matmul %90, %11, %cst_87 {dimension_numbers = #tpu.dot_dimension_numbers<[1], [0], [0], [1], [0, 0, 1, 1], [], []>} : vector<32x24xf32>, vector<24x252xf32>, vector<32x252xf32> -> vector<32x252xf32>
    %92 = arith.addf %88, %91 : vector<32x252xf32>
    %c4_88 = arith.constant 4 : index
    %c0_89 = arith.constant 0 : index
    %c0_90 = arith.constant 0 : index
    %93 = vector.load %arg2[%c4_88, %c0_89, %c0_90] : memref<6x32x24xf32, #tpu.memory_space<vmem>>, vector<1x32x24xf32>
    %94 = vector.shape_cast %93 : vector<1x32x24xf32> to vector<32x24xf32>
    %cst_91 = arith.constant dense<0.000000e+00> : vector<32x252xf32>
    %95 = tpu.matmul %94, %13, %cst_91 {dimension_numbers = #tpu.dot_dimension_numbers<[1], [0], [0], [1], [0, 0, 1, 1], [], []>} : vector<32x24xf32>, vector<24x252xf32>, vector<32x252xf32> -> vector<32x252xf32>
    %96 = arith.addf %92, %95 : vector<32x252xf32>
    %c5_92 = arith.constant 5 : index
    %c0_93 = arith.constant 0 : index
    %c0_94 = arith.constant 0 : index
    %97 = vector.load %arg2[%c5_92, %c0_93, %c0_94] : memref<6x32x24xf32, #tpu.memory_space<vmem>>, vector<1x32x24xf32>
    %98 = vector.shape_cast %97 : vector<1x32x24xf32> to vector<32x24xf32>
    %cst_95 = arith.constant dense<0.000000e+00> : vector<32x252xf32>
    %99 = tpu.matmul %98, %15, %cst_95 {dimension_numbers = #tpu.dot_dimension_numbers<[1], [0], [0], [1], [0, 0, 1, 1], [], []>} : vector<32x24xf32>, vector<24x252xf32>, vector<32x252xf32> -> vector<32x252xf32>
    %100 = arith.addf %96, %99 : vector<32x252xf32>
    %c0_96 = arith.constant 0 : index
    %c0_97 = arith.constant 0 : index
    %c0_98 = arith.constant 0 : index
    %101 = vector.load %arg2[%c0_96, %c0_97, %c0_98] : memref<6x32x24xf32, #tpu.memory_space<vmem>>, vector<1x32x24xf32>
    %102 = vector.shape_cast %101 : vector<1x32x24xf32> to vector<32x24xf32>
    %cst_99 = arith.constant dense<0.000000e+00> : vector<32x252xf32>
    %103 = tpu.matmul %102, %7, %cst_99 {dimension_numbers = #tpu.dot_dimension_numbers<[1], [0], [0], [1], [0, 0, 1, 1], [], []>} : vector<32x24xf32>, vector<24x252xf32>, vector<32x252xf32> -> vector<32x252xf32>
    %c1_100 = arith.constant 1 : index
    %c0_101 = arith.constant 0 : index
    %c0_102 = arith.constant 0 : index
    %104 = vector.load %arg2[%c1_100, %c0_101, %c0_102] : memref<6x32x24xf32, #tpu.memory_space<vmem>>, vector<1x32x24xf32>
    %105 = vector.shape_cast %104 : vector<1x32x24xf32> to vector<32x24xf32>
    %cst_103 = arith.constant dense<0.000000e+00> : vector<32x252xf32>
    %106 = tpu.matmul %105, %9, %cst_103 {dimension_numbers = #tpu.dot_dimension_numbers<[1], [0], [0], [1], [0, 0, 1, 1], [], []>} : vector<32x24xf32>, vector<24x252xf32>, vector<32x252xf32> -> vector<32x252xf32>
    %107 = arith.addf %103, %106 : vector<32x252xf32>
    %c2_104 = arith.constant 2 : index
    %c0_105 = arith.constant 0 : index
    %c0_106 = arith.constant 0 : index
    %108 = vector.load %arg2[%c2_104, %c0_105, %c0_106] : memref<6x32x24xf32, #tpu.memory_space<vmem>>, vector<1x32x24xf32>
    %109 = vector.shape_cast %108 : vector<1x32x24xf32> to vector<32x24xf32>
    %cst_107 = arith.constant dense<0.000000e+00> : vector<32x252xf32>
    %110 = tpu.matmul %109, %11, %cst_107 {dimension_numbers = #tpu.dot_dimension_numbers<[1], [0], [0], [1], [0, 0, 1, 1], [], []>} : vector<32x24xf32>, vector<24x252xf32>, vector<32x252xf32> -> vector<32x252xf32>
    %111 = arith.addf %107, %110 : vector<32x252xf32>
    %c3_108 = arith.constant 3 : index
    %c0_109 = arith.constant 0 : index
    %c0_110 = arith.constant 0 : index
    %112 = vector.load %arg2[%c3_108, %c0_109, %c0_110] : memref<6x32x24xf32, #tpu.memory_space<vmem>>, vector<1x32x24xf32>
    %113 = vector.shape_cast %112 : vector<1x32x24xf32> to vector<32x24xf32>
    %cst_111 = arith.constant dense<0.000000e+00> : vector<32x252xf32>
    %114 = tpu.matmul %113, %13, %cst_111 {dimension_numbers = #tpu.dot_dimension_numbers<[1], [0], [0], [1], [0, 0, 1, 1], [], []>} : vector<32x24xf32>, vector<24x252xf32>, vector<32x252xf32> -> vector<32x252xf32>
    %115 = arith.addf %111, %114 : vector<32x252xf32>
    %c4_112 = arith.constant 4 : index
    %c0_113 = arith.constant 0 : index
    %c0_114 = arith.constant 0 : index
    %116 = vector.load %arg2[%c4_112, %c0_113, %c0_114] : memref<6x32x24xf32, #tpu.memory_space<vmem>>, vector<1x32x24xf32>
    %117 = vector.shape_cast %116 : vector<1x32x24xf32> to vector<32x24xf32>
    %cst_115 = arith.constant dense<0.000000e+00> : vector<32x252xf32>
    %118 = tpu.matmul %117, %15, %cst_115 {dimension_numbers = #tpu.dot_dimension_numbers<[1], [0], [0], [1], [0, 0, 1, 1], [], []>} : vector<32x24xf32>, vector<24x252xf32>, vector<32x252xf32> -> vector<32x252xf32>
    %119 = arith.addf %115, %118 : vector<32x252xf32>
    %c5_116 = arith.constant 5 : index
    %c0_117 = arith.constant 0 : index
    %c0_118 = arith.constant 0 : index
    %120 = vector.load %arg2[%c5_116, %c0_117, %c0_118] : memref<6x32x24xf32, #tpu.memory_space<vmem>>, vector<1x32x24xf32>
    %121 = vector.shape_cast %120 : vector<1x32x24xf32> to vector<32x24xf32>
    %cst_119 = arith.constant dense<0.000000e+00> : vector<32x252xf32>
    %122 = tpu.matmul %121, %17, %cst_119 {dimension_numbers = #tpu.dot_dimension_numbers<[1], [0], [0], [1], [0, 0, 1, 1], [], []>} : vector<32x24xf32>, vector<24x252xf32>, vector<32x252xf32> -> vector<32x252xf32>
    %123 = arith.addf %119, %122 : vector<32x252xf32>
    %124 = arith.maximumf %100, %123 : vector<32x252xf32>
    %125 = vector.broadcast %18 : vector<32x1xf32> to vector<32x252xf32>
    %126 = arith.addf %124, %125 : vector<32x252xf32>
    %cst_120 = arith.constant 0.000000e+00 : f32
    %127 = vector.broadcast %cst_120 : f32 to vector<32x252xf32>
    %128 = arith.maximumf %126, %127 : vector<32x252xf32>
    %cst_121 = arith.constant 0.000000e+00 : f32
    %129 = vector.broadcast %cst_121 : f32 to vector<32x252xf32>
    %130 = arith.select %24, %129, %128 : vector<32x252xi1>, vector<32x252xf32>
    %c0_122 = arith.constant 0 : index
    %c0_123 = arith.constant 0 : index
    %c0_124 = arith.constant 0 : index
    %131 = vector.load %arg4[%c0_122, %c0_123, %c0_124] : memref<4x64x32xf32, #tpu.memory_space<vmem>>, vector<1x64x32xf32>
    %132 = vector.shape_cast %131 : vector<1x64x32xf32> to vector<64x32xf32>
    %133 = vector.extract_strided_slice %77 {offsets = [0, 0], sizes = [32, 250], strides = [1, 1]} : vector<32x252xf32> to vector<32x250xf32>
    %cst_125 = arith.constant dense<0.000000e+00> : vector<64x250xf32>
    %134 = tpu.matmul %132, %133, %cst_125 {dimension_numbers = #tpu.dot_dimension_numbers<[1], [0], [0], [1], [0, 0, 1, 1], [], []>} : vector<64x32xf32>, vector<32x250xf32>, vector<64x250xf32> -> vector<64x250xf32>
    %c1_126 = arith.constant 1 : index
    %c0_127 = arith.constant 0 : index
    %c0_128 = arith.constant 0 : index
    %135 = vector.load %arg4[%c1_126, %c0_127, %c0_128] : memref<4x64x32xf32, #tpu.memory_space<vmem>>, vector<1x64x32xf32>
    %136 = vector.shape_cast %135 : vector<1x64x32xf32> to vector<64x32xf32>
    %137 = vector.extract_strided_slice %130 {offsets = [0, 0], sizes = [32, 250], strides = [1, 1]} : vector<32x252xf32> to vector<32x250xf32>
    %cst_129 = arith.constant dense<0.000000e+00> : vector<64x250xf32>
    %138 = tpu.matmul %136, %137, %cst_129 {dimension_numbers = #tpu.dot_dimension_numbers<[1], [0], [0], [1], [0, 0, 1, 1], [], []>} : vector<64x32xf32>, vector<32x250xf32>, vector<64x250xf32> -> vector<64x250xf32>
    %139 = arith.addf %134, %138 : vector<64x250xf32>
    %c2_130 = arith.constant 2 : index
    %c0_131 = arith.constant 0 : index
    %c0_132 = arith.constant 0 : index
    %140 = vector.load %arg4[%c2_130, %c0_131, %c0_132] : memref<4x64x32xf32, #tpu.memory_space<vmem>>, vector<1x64x32xf32>
    %141 = vector.shape_cast %140 : vector<1x64x32xf32> to vector<64x32xf32>
    %142 = vector.extract_strided_slice %77 {offsets = [0, 1], sizes = [32, 250], strides = [1, 1]} : vector<32x252xf32> to vector<32x250xf32>
    %cst_133 = arith.constant dense<0.000000e+00> : vector<64x250xf32>
    %143 = tpu.matmul %141, %142, %cst_133 {dimension_numbers = #tpu.dot_dimension_numbers<[1], [0], [0], [1], [0, 0, 1, 1], [], []>} : vector<64x32xf32>, vector<32x250xf32>, vector<64x250xf32> -> vector<64x250xf32>
    %144 = arith.addf %139, %143 : vector<64x250xf32>
    %c3_134 = arith.constant 3 : index
    %c0_135 = arith.constant 0 : index
    %c0_136 = arith.constant 0 : index
    %145 = vector.load %arg4[%c3_134, %c0_135, %c0_136] : memref<4x64x32xf32, #tpu.memory_space<vmem>>, vector<1x64x32xf32>
    %146 = vector.shape_cast %145 : vector<1x64x32xf32> to vector<64x32xf32>
    %147 = vector.extract_strided_slice %130 {offsets = [0, 1], sizes = [32, 250], strides = [1, 1]} : vector<32x252xf32> to vector<32x250xf32>
    %cst_137 = arith.constant dense<0.000000e+00> : vector<64x250xf32>
    %148 = tpu.matmul %146, %147, %cst_137 {dimension_numbers = #tpu.dot_dimension_numbers<[1], [0], [0], [1], [0, 0, 1, 1], [], []>} : vector<64x32xf32>, vector<32x250xf32>, vector<64x250xf32> -> vector<64x250xf32>
    %149 = arith.addf %144, %148 : vector<64x250xf32>
    %c0_138 = arith.constant 0 : index
    %c0_139 = arith.constant 0 : index
    %c0_140 = arith.constant 0 : index
    %150 = vector.load %arg4[%c0_138, %c0_139, %c0_140] : memref<4x64x32xf32, #tpu.memory_space<vmem>>, vector<1x64x32xf32>
    %151 = vector.shape_cast %150 : vector<1x64x32xf32> to vector<64x32xf32>
    %152 = vector.extract_strided_slice %130 {offsets = [0, 0], sizes = [32, 250], strides = [1, 1]} : vector<32x252xf32> to vector<32x250xf32>
    %cst_141 = arith.constant dense<0.000000e+00> : vector<64x250xf32>
    %153 = tpu.matmul %151, %152, %cst_141 {dimension_numbers = #tpu.dot_dimension_numbers<[1], [0], [0], [1], [0, 0, 1, 1], [], []>} : vector<64x32xf32>, vector<32x250xf32>, vector<64x250xf32> -> vector<64x250xf32>
    %c1_142 = arith.constant 1 : index
    %c0_143 = arith.constant 0 : index
    %c0_144 = arith.constant 0 : index
    %154 = vector.load %arg4[%c1_142, %c0_143, %c0_144] : memref<4x64x32xf32, #tpu.memory_space<vmem>>, vector<1x64x32xf32>
    %155 = vector.shape_cast %154 : vector<1x64x32xf32> to vector<64x32xf32>
    %156 = vector.extract_strided_slice %77 {offsets = [0, 1], sizes = [32, 250], strides = [1, 1]} : vector<32x252xf32> to vector<32x250xf32>
    %cst_145 = arith.constant dense<0.000000e+00> : vector<64x250xf32>
    %157 = tpu.matmul %155, %156, %cst_145 {dimension_numbers = #tpu.dot_dimension_numbers<[1], [0], [0], [1], [0, 0, 1, 1], [], []>} : vector<64x32xf32>, vector<32x250xf32>, vector<64x250xf32> -> vector<64x250xf32>
    %158 = arith.addf %153, %157 : vector<64x250xf32>
    %c2_146 = arith.constant 2 : index
    %c0_147 = arith.constant 0 : index
    %c0_148 = arith.constant 0 : index
    %159 = vector.load %arg4[%c2_146, %c0_147, %c0_148] : memref<4x64x32xf32, #tpu.memory_space<vmem>>, vector<1x64x32xf32>
    %160 = vector.shape_cast %159 : vector<1x64x32xf32> to vector<64x32xf32>
    %161 = vector.extract_strided_slice %130 {offsets = [0, 1], sizes = [32, 250], strides = [1, 1]} : vector<32x252xf32> to vector<32x250xf32>
    %cst_149 = arith.constant dense<0.000000e+00> : vector<64x250xf32>
    %162 = tpu.matmul %160, %161, %cst_149 {dimension_numbers = #tpu.dot_dimension_numbers<[1], [0], [0], [1], [0, 0, 1, 1], [], []>} : vector<64x32xf32>, vector<32x250xf32>, vector<64x250xf32> -> vector<64x250xf32>
    %163 = arith.addf %158, %162 : vector<64x250xf32>
    %c3_150 = arith.constant 3 : index
    %c0_151 = arith.constant 0 : index
    %c0_152 = arith.constant 0 : index
    %164 = vector.load %arg4[%c3_150, %c0_151, %c0_152] : memref<4x64x32xf32, #tpu.memory_space<vmem>>, vector<1x64x32xf32>
    %165 = vector.shape_cast %164 : vector<1x64x32xf32> to vector<64x32xf32>
    %166 = vector.extract_strided_slice %77 {offsets = [0, 2], sizes = [32, 250], strides = [1, 1]} : vector<32x252xf32> to vector<32x250xf32>
    %cst_153 = arith.constant dense<0.000000e+00> : vector<64x250xf32>
    %167 = tpu.matmul %165, %166, %cst_153 {dimension_numbers = #tpu.dot_dimension_numbers<[1], [0], [0], [1], [0, 0, 1, 1], [], []>} : vector<64x32xf32>, vector<32x250xf32>, vector<64x250xf32> -> vector<64x250xf32>
    %168 = arith.addf %163, %167 : vector<64x250xf32>
    %169 = arith.maximumf %149, %168 : vector<64x250xf32>
    %c0_154 = arith.constant 0 : index
    %c0_155 = arith.constant 0 : index
    %170 = vector.load %arg5[%c0_154, %c0_155] : memref<64x1xf32, #tpu.memory_space<vmem>>, vector<64x1xf32>
    %171 = vector.broadcast %170 : vector<64x1xf32> to vector<64x250xf32>
    %172 = arith.addf %169, %171 : vector<64x250xf32>
    %cst_156 = arith.constant 0.000000e+00 : f32
    %173 = vector.broadcast %cst_156 : f32 to vector<64x250xf32>
    %174 = arith.maximumf %172, %173 : vector<64x250xf32>
    %c0_157 = arith.constant 0 : index
    %c0_158 = arith.constant 0 : index
    %175 = vector.load %arg6[%c0_157, %c0_158] : memref<64x250xf32, #tpu.memory_space<vmem>>, vector<64x250xf32>
    %176 = arith.mulf %174, %175 : vector<64x250xf32>
    %cst_159 = arith.constant dense<0.000000e+00> : vector<64xf32>
    %177 = vector.multi_reduction <add>, %176, %cst_159 [1] : vector<64x250xf32> to vector<64xf32>
    %178 = vector.shape_cast %177 : vector<64xf32> to vector<64x1xf32>
    %c0_160 = arith.constant 0 : index
    %c0_161 = arith.constant 0 : index
    %179 = vector.load %arg7[%c0_160, %c0_161] : memref<8x64xf32, #tpu.memory_space<vmem>>, vector<8x64xf32>
    %cst_162 = arith.constant dense<0.000000e+00> : vector<8x1xf32>
    %180 = tpu.matmul %179, %178, %cst_162 {dimension_numbers = #tpu.dot_dimension_numbers<[1], [0], [0], [1], [0, 0, 1, 1], [], []>} : vector<8x64xf32>, vector<64x1xf32>, vector<8x1xf32> -> vector<8x1xf32>
    %c0_163 = arith.constant 0 : index
    %181 = memref.load %arg8[%c0_163] : memref<1xf32, #tpu.memory_space<smem>>
    %182 = vector.broadcast %181 : f32 to vector<8x1xf32>
    %183 = arith.addf %180, %182 : vector<8x1xf32>
    %184 = math.absf %183 : vector<8x1xf32>
    %cst_164 = arith.constant 0.000000e+00 : f32
    %185 = vector.broadcast %cst_164 : f32 to vector<8x1xf32>
    %186 = arith.subf %185, %184 : vector<8x1xf32>
    %187 = math.exp %186 : vector<8x1xf32>
    %cst_165 = arith.constant 0.000000e+00 : f32
    %188 = vector.broadcast %cst_165 : f32 to vector<8x1xf32>
    %189 = arith.cmpf oge, %183, %188 : vector<8x1xf32>
    %cst_166 = arith.constant 1.000000e+00 : f32
    %190 = vector.broadcast %cst_166 : f32 to vector<8x1xf32>
    %191 = arith.addf %190, %187 : vector<8x1xf32>
    %cst_167 = arith.constant 1.000000e+00 : f32
    %192 = vector.broadcast %cst_167 : f32 to vector<8x1xf32>
    %193 = arith.divf %192, %191 : vector<8x1xf32>
    %cst_168 = arith.constant 1.000000e+00 : f32
    %194 = vector.broadcast %cst_168 : f32 to vector<8x1xf32>
    %195 = arith.addf %194, %187 : vector<8x1xf32>
    %196 = arith.divf %187, %195 : vector<8x1xf32>
    %197 = arith.select %189, %193, %196 : vector<8x1xi1>, vector<8x1xf32>
    %c0_169 = arith.constant 0 : index
    %c0_170 = arith.constant 0 : index
    %198 = vector.load %arg9[%c0_169, %c0_170] : memref<8x1xf32, #tpu.memory_space<vmem>>, vector<8x1xf32>
    tpu.vector_store %arg9[%c0_169, %c0_170], %197 {strides = array<i32>} : memref<8x1xf32, #tpu.memory_space<vmem>>, vector<8x1xf32>,
    return
  }
  func.func @transform_0(%arg0: i32) -> (i32, i32, i32) {
    %c0_i32 = arith.constant 0 : i32
    %c0_i32_0 = arith.constant 0 : i32
    %c0_i32_1 = arith.constant 0 : i32
    return %c0_i32, %arg0, %c0_i32_0 : i32, i32, i32
  }
  func.func @transform_1(%arg0: i32) -> (i32, i32, i32) {
    %c0_i32 = arith.constant 0 : i32
    %c0_i32_0 = arith.constant 0 : i32
    %c0_i32_1 = arith.constant 0 : i32
    %c0_i32_2 = arith.constant 0 : i32
    return %c0_i32, %c0_i32_0, %c0_i32_1 : i32, i32, i32
  }
  func.func @transform_2(%arg0: i32) -> (i32, i32) {
    %c0_i32 = arith.constant 0 : i32
    %c0_i32_0 = arith.constant 0 : i32
    %c0_i32_1 = arith.constant 0 : i32
    return %c0_i32, %c0_i32_0 : i32, i32
  }
  func.func @transform_3(%arg0: i32) -> (i32, i32, i32) {
    %c0_i32 = arith.constant 0 : i32
    %c0_i32_0 = arith.constant 0 : i32
    %c0_i32_1 = arith.constant 0 : i32
    %c0_i32_2 = arith.constant 0 : i32
    return %c0_i32, %c0_i32_0, %c0_i32_1 : i32, i32, i32
  }
  func.func @transform_4(%arg0: i32) -> (i32, i32) {
    %c0_i32 = arith.constant 0 : i32
    %c0_i32_0 = arith.constant 0 : i32
    %c0_i32_1 = arith.constant 0 : i32
    return %c0_i32, %c0_i32_0 : i32, i32
  }
  func.func @transform_5(%arg0: i32) -> (i32, i32) {
    %c0_i32 = arith.constant 0 : i32
    %c0_i32_0 = arith.constant 0 : i32
    %c0_i32_1 = arith.constant 0 : i32
    return %c0_i32, %c0_i32_0 : i32, i32
  }
  func.func @transform_6(%arg0: i32) -> (i32, i32) {
    %c0_i32 = arith.constant 0 : i32
    %c0_i32_0 = arith.constant 0 : i32
    %c0_i32_1 = arith.constant 0 : i32
    return %c0_i32, %c0_i32_0 : i32, i32
  }
  func.func @transform_7(%arg0: i32) -> i32 {
    %c0_i32 = arith.constant 0 : i32
    %c0_i32_0 = arith.constant 0 : i32
    return %c0_i32 : i32
  }
  func.func @transform_8(%arg0: i32) -> (i32, i32) {
    %c0_i32 = arith.constant 0 : i32
    %c0_i32_0 = arith.constant 0 : i32
    return %arg0, %c0_i32 : i32, i32
  }
}

</mosaic_0001>

<bundles_post_ra>
// kernel: tpu_custom_call.1
= control target key start
LH: loop header
LB: loop body
LE: loop exit
PB: predicated region body
PF: predicated region fallthrough
CT: control target
= control target key end

     0   :  { %v4966_v3 = vmov 0.0   ;;  %s4967_s15 = smov 127   ;;  %vm79_vm0 = vcmask 195584   ;;  %vm533_vm1 = vcmask 1039360   ;;  %v4969_v63 = vmov 0   ;;  %s6230_s0 = inlined_call_operand.vmem [shape: f32[4,24,256], index: 0, kind: input, shape index: {}]   ;;  %s6231_s1 = inlined_call_operand.vmem [shape: f32[6,32,24], index: 1, kind: input, shape index: {}]   ;;  %s6232_s2 = inlined_call_operand.vmem [shape: f32[32,1], index: 2, kind: input, shape index: {}]   ;;  %s6233_s3 = inlined_call_operand.vmem [shape: f32[4,64,32], index: 3, kind: input, shape index: {}]   ;;  %s6234_s4 = inlined_call_operand.vmem [shape: f32[64,1], index: 4, kind: input, shape index: {}]   ;;  %s6235_s5 = inlined_call_operand.vmem [shape: f32[64,250], index: 5, kind: input, shape index: {}]   ;;  %s6236_s6 = inlined_call_operand.vmem [shape: f32[8,64], index: 6, kind: input, shape index: {}]   ;;  %s6237_s7 = inlined_call_operand.<no memory space> [shape: f32[1], index: 7, kind: input, shape index: {}]   ;;  %s6238_s8 = inlined_call_operand.vmem [shape: f32[8,1], index: 8, kind: output, shape index: {}]  }
   0x1   :  { %v30_v0 = vld [vmem:[%s6230_s0] sm:$0xff]  ;;  %v31_v1 = vld [vmem:[%s6230_s0 + $0x8] sm:$0xff]  ;;  %v32_v2 = vld [vmem:[%s6230_s0 + $0x10] sm:$0xff]  ;;  %156 = vmatprep.mubr.f32.mxu0 %v4966_v3  ;;  %857 = vmatprep.mubr.f32.mxu1 %v4966_v3  ;;  %vm2512_vm2 = vcmask 1031168   ;;  %vm2668_vm9 = vcmask 261120   ;;  %vm3979_vm10 = vcmask 998400  }
   0x2   :  { %v5028_v4 = vpack.i.bf16 %v31_v1, %v30_v0  ;;  %v5033_v5 = vld [vmem:[%s6230_s0 + $0x20] sm:$0xff]  ;;  %v33_v6 = vld [vmem:[%s6230_s0 + $0x18] sm:$0xff]  ;;  %v4105_v8 = vld [vmem:[%s6230_s0 + $0x30] sm:$0xff]  ;;  %v4410_v25 = vpack.c.bf16 %v32_v2, %v30_v0  ;;  %4900 = vset.pattern.permute.xlu0 %v4969_v63  ;;  %4901 = vset.pattern.permute.xlu1 %v4969_v63  ;;  %vm4971_vm11 = vmmov 0   ;;  %vm4015_vm12 = vcmask 523264  }
   0x3   :  { %529 = vrot.lane.b32.xlu1 %v5033_v5, %s4967_s15  ;;  %v4107_v7 = vld [vmem:[%s6230_s0 + $0x40] sm:$0xff]  ;;  %v5048_v9 = vpack.i.bf16 %v33_v6, %v32_v2  ;;  %v5053_v10 = vld [vmem:[%s6230_s0 + $0x28] sm:$0xff]  ;;  %v4106_v12 = vld [vmem:[%s6230_s0 + $0x38] sm:$0xff]  ;;  %v4408_v24 = vpack.c.bf16 %v33_v6, %v31_v1  ;;  %vm4099_vm13 = vcmask 7168  }
   0x4   :  { %4851 = vrot.lane.b32.xlu0 %v5028_v4, %s4967_s15  ;;  %v4108_v11 = vld [vmem:[%s6230_s0 + $0x48] sm:$0xff]  ;;  %v4406_v13 = vpack.c.bf16 %v4107_v7, %v4105_v8  ;;  %v4113_v14 = vld [vmem:[%s6230_s0 + $0x70] sm:$0xff]  ;;  %v4111_v15 = vld [vmem:[%s6230_s0 + $0x60] sm:$0xff]  ;;  %v4860_v22 = vpack.i.bf16 %v4106_v12, %v4105_v8 }
   0x5   :  { %v4404_v16 = vpack.c.bf16 %v4108_v11, %v4106_v12  ;;  %v4114_v17 = vld [vmem:[%s6230_s0 + $0x78] sm:$0xff]  ;;  %v4112_v18 = vld [vmem:[%s6230_s0 + $0x68] sm:$0xff]  ;;  %v5073_v19 = vpack.c.bf16 %v4113_v14, %v4111_v15  ;;  %v4865_v20 = vpack.i.bf16 %v4108_v11, %v4107_v7  ;;  %v5093_v27 = vld [vmem:[%s6231_s1 + $0x20] sm:$0xff] }
   0x6   :  { %v5077_v21 = vpack.c.bf16 %v4114_v17, %v4112_v18  ;;  %v4110_v23 = vld [vmem:[%s6230_s0 + $0x58] sm:$0xff]  ;;  %v5088_v26 = vld [vmem:[%s6230_s0 + $0x88] sm:$0xff]  ;;  %v4109_v28 = vld [vmem:[%s6230_s0 + $0x50] sm:$0xff]  ;;  %v4875_v30 = vpack.i.bf16 %v4114_v17, %v4113_v14  ;;  %v4870_v32 = vpack.i.bf16 %v4112_v18, %v4111_v15 }
   0x7   :  { %531 = vrot.lane.b32.xlu1 %v5053_v10, %s4967_s15  ;;  %4405 = vmatprep.subr.bf16.mxu0 %v4404_v16  ;;  %v5108_v29 = vld [vmem:[%s6231_s1 + $0x28] sm:$0xff]  ;;  %v5114_v31 = vld [vmem:[%s6230_s0 + $0x80] sm:$0xff]  ;;  %v5127_v33 = vld [vmem:[%s6231_s1 + $0x30] sm:$0xff] }
   0x8   :  { %4856 = vrot.lane.b32.xlu0 %v5048_v9, %s4967_s15  ;;  %4407 = vmatpush1.bf16.msra.mxu0 %v4406_v13  ;;  %v5142_v34 = vld [vmem:[%s6231_s1 + $0x38] sm:$0xff]  ;;  %v4120_v35 = vld [vmem:[%s6230_s0 + $0xa8] sm:$0xff]  ;;  %v4119_v36 = vld [vmem:[%s6230_s0 + $0xa0] sm:$0xff] }
   0x9   :  { %96 = vmatprep.subr.mxu0 %v4110_v23  ;;  %4429 = vmatprep.subr.bf16.mxu1 %v5077_v21  ;;  %v4118_v37 = vld [vmem:[%s6230_s0 + $0x98] sm:$0xff]  ;;  %v4117_v38 = vld [vmem:[%s6230_s0 + $0x90] sm:$0xff]  ;;  %v4885_v39 = vpack.i.bf16 %v4120_v35, %v4119_v36  ;;  %v5169_v41 = vld [vmem:[%s6231_s1] sm:$0xff] }
   0xa   :  { %4431 = vmatpush1.bf16.msra.mxu1 %v5073_v19  ;;  %v4880_v40 = vpack.i.bf16 %v4118_v37, %v4117_v38  ;;  %v5173_v42 = vpack.c.bf16 %v4120_v35, %v4118_v37  ;;  %v5184_v43 = vld [vmem:[%s6231_s1 + $0x8] sm:$0xff]  ;;  %v5192_v44 = vld [vmem:[%s6230_s0 + $0xb8] sm:$0xff]  ;;  %v5195_v45 = vpack.c.bf16 %v4119_v36, %v4117_v38  ;;  %v5207_v46 = vld [vmem:[%s6231_s1 + $0x10] sm:$0xff] }
   0xb   :  { %4866 = vrot.lane.b32.xlu1 %v4865_v20, %s4967_s15  ;;  %797 = vmatprep.subr.mxu1 %v5088_v26  ;;  %v5215_v47 = vld [vmem:[%s6230_s0 + $0xb0] sm:$0xff]  ;;  %v5228_v48 = vld [vmem:[%s6231_s1 + $0x18] sm:$0xff]  ;;  %s4968_s0 = smov 126   ;;  %v5245_v49 = vld [vmem:[%s6231_s1 + $0x40] sm:$0xff] }
   0xc   :  { %4861 = vrot.lane.b32.xlu0 %v4860_v22, %s4967_s15  ;;  %97 = vmatpush1.msra.mxu0 %v4109_v28  ;;  %v5260_v50 = vld [vmem:[%s6231_s1 + $0x48] sm:$0xff]  ;;  %v5273_v51 = vld [vmem:[%s6231_s1 + $0x50] sm:$0xff]  ;;  %v5285_v52 = vld [vmem:[%s6231_s1 + $0x58] sm:$0xff] }
   0xd   :  { %4127 = vmatmul.mubr.msk.f32.vlgmr.msra.gmra.mrb[0].mxu0 %vm79_vm0, %v5093_v27  ;;  %4409 = vmatprep.subr.bf16.mxu0 %v4408_v24  ;;  %v5296_v53 = vld [vmem:[%s6231_s1 + $0x60] sm:$0xff]  ;;  %v5307_v54 = vld [vmem:[%s6231_s1 + $0x68] sm:$0xff]  ;;  %v5316_v55 = vld [vmem:[%s6231_s1 + $0x70] sm:$0xff] }
   0xe   :  { %162 = vmatprep.mubr.f32.mxu0 %v4966_v3  ;;  %4411 = vmatpush1.bf16.msra.mxu0 %v4410_v25  ;;  %v5324_v56 = vld [vmem:[%s6231_s1 + $0x78] sm:$0xff]  ;;  %v57_v0 = vld [vmem:[%s6232_s2] sm:$0xff]  ;;  %v58_v8 = vld [vmem:[%s6232_s2 + $0x8] sm:$0xff] }
   0xf   :  { %673 = vrot.lane.b32.xlu1 %v4110_v23, %s4967_s15  ;;  %197 = vmatprep.subr.mxu0 %v5053_v10  ;;  %v59_v18 = vld [vmem:[%s6232_s2 + $0x10] sm:$0xff]  ;;  %v5359_v20 = vld [vmem:[%s6231_s1 + $0x80] sm:$0xff] }
  0x10   :  { %671 = vrot.lane.b32.xlu0 %v4109_v28, %s4967_s15  ;;  %798 = vmatpush1.msra.mxu1 %v5114_v31  ;;  %v5399_v38 = vld [vmem:[%s6231_s1 + $0x90] sm:$0xff] }
  0x11   :  { %4128 = vmatmul.mubr.msk.f32.gmra.mrb[2].mxu0 %vm79_vm0, %v5108_v29  ;;  %4167 = vmatmul.mubr.msk.f32.vlgmr.msra.gmra.mrb[0].mxu1 %vm79_vm0, %v5093_v27 }
  0x12   :  { %168 = vmatprep.mubr.f32.mxu0 %v4966_v3  ;;  %198 = vmatpush1.msra.mxu0 %v5033_v5 }
  0x13   :  { %4876 = vrot.lane.b32.xlu1 %v4875_v30, %s4967_s15  ;;  %863 = vmatprep.mubr.f32.mxu1 %v4966_v3  ;;  %v5380_v30 = vld [vmem:[%s6231_s1 + $0x88] sm:$0xff] }
  0x14   :  { %4871 = vrot.lane.b32.xlu0 %v4870_v32, %s4967_s15  ;;  %4413 = vmatprep.subr.bf16.mxu0 %v5077_v21 }
  0x15   :  { %4129 = vmatmul.mubr.msk.f32.gmra.mrb[4].mxu0 %vm79_vm0, %v5127_v33  ;;  %4168 = vmatmul.mubr.msk.f32.gmra.mrb[2].mxu1 %vm79_vm0, %v5108_v29 }
  0x16   :  { %174 = vmatprep.mubr.f32.mxu0 %v4966_v3  ;;  %869 = vmatprep.mubr.f32.mxu1 %v4966_v3 }
  0x17   :  { %1278 = vrot.lane.b32.xlu1 %v5088_v26, %s4967_s15  ;;  %4433 = vmatprep.subr.bf16.mxu1 %v4404_v16 }
  0x18   :  { %1276 = vrot.lane.b32.xlu0 %v5114_v31, %s4967_s15  ;;  %4435 = vmatpush1.bf16.msra.mxu1 %v4406_v13 }
  0x19   :  { %4130 = vmatmul.mubr.msk.f32.gmra.mrb[6].mxu0 %vm79_vm0, %v5142_v34  ;;  %4169 = vmatmul.mubr.msk.f32.gmra.mrb[4].mxu1 %vm79_vm0, %v5127_v33 }
  0x1a   :  { %257 = vmatprep.mubr.f32.mxu0 %v4966_v3  ;;  %875 = vmatprep.mubr.f32.mxu1 %v4966_v3 }
  0x1b   :  { %886 = vmatprep.subr.mxu1 %v4110_v23  ;;  %4886 = vrot.lane.b32.xlu1 %v4885_v39, %s4967_s15 }
  0x1c   :  { %887 = vmatpush1.msra.mxu1 %v4109_v28  ;;  %4881 = vrot.lane.b32.xlu0 %v4880_v40, %s4967_s15 }
  0x1d   :  { %4131 = vmatmul.mubr.msk.f32.vlgmr.msra.gmra.mrb[0].mxu0 %vm79_vm0, %v5169_v41  ;;  %4170 = vmatmul.mubr.msk.f32.gmra.mrb[6].mxu1 %vm79_vm0, %v5142_v34 }
  0x1e   :  { %263 = vmatprep.mubr.f32.mxu0 %v4966_v3  ;;  %4415 = vmatpush1.bf16.msra.mxu0 %v5073_v19 }
  0x1f   :  { %303 = vmatprep.subr.mxu0 %v5088_v26  ;;  %946 = vmatprep.mubr.f32.mxu1 %v4966_v3 }
  0x20   :  { %4437 = vmatprep.subr.bf16.mxu1 %v5173_v42  ;;  %1923 = vrot.lane.b32.xlu1 %v5192_v44, %s4967_s15 }
  0x21   :  { %4132 = vmatmul.mubr.msk.f32.gmra.mrb[2].mxu0 %vm79_vm0, %v5184_v43  ;;  %4171 = vmatmul.mubr.msk.f32.vlgmr.msra.gmra.mrb[0].mxu1 %vm79_vm0, %v5169_v41 }
  0x22   :  { %269 = vmatprep.mubr.f32.mxu0 %v4966_v3  ;;  %304 = vmatpush1.msra.mxu0 %v5114_v31 }
  0x23   :  { %952 = vmatprep.mubr.f32.mxu1 %v4966_v3  ;;  %4417 = vmatprep.subr.bf16.mxu0 %v5173_v42 }
  0x24   :  { %4439 = vmatpush1.bf16.msra.mxu1 %v5195_v45  ;;  %1921 = vrot.lane.b32.xlu0 %v5215_v47, %s4967_s15 }
  0x25   :  { %4133 = vmatmul.mubr.msk.f32.gmra.mrb[4].mxu0 %vm79_vm0, %v5207_v46  ;;  %4172 = vmatmul.mubr.msk.f32.gmra.mrb[2].mxu1 %vm79_vm0, %v5184_v43 }
  0x26   :  { %275 = vmatprep.mubr.f32.mxu0 %v4966_v3  ;;  %958 = vmatprep.mubr.f32.mxu1 %v4966_v3 }
  0x27   :  { %975 = vmatprep.subr.mxu1 %v5192_v44  ;;  %4896 = vrot.lane.b32.xlu1 %v5048_v9, %s4968_s0 }
  0x28   :  { %976 = vmatpush1.msra.mxu1 %v5215_v47  ;;  %4891 = vrot.lane.b32.xlu0 %v5028_v4, %s4968_s0 }
  0x29   :  { %4134 = vmatmul.mubr.msk.f32.gmra.mrb[6].mxu0 %vm79_vm0, %v5228_v48  ;;  %4173 = vmatmul.mubr.msk.f32.gmra.mrb[4].mxu1 %vm79_vm0, %v5207_v46 }
  0x2a   :  { %363 = vmatprep.mubr.f32.mxu0 %v4966_v3  ;;  %964 = vmatprep.mubr.f32.mxu1 %v4966_v3 }
  0x2b   :  { %2510 = vrot.lane.b32.xlu1 %v5053_v10, %s4968_s0 }
  0x2c   :  { %2508 = vrot.lane.b32.xlu0 %v5033_v5, %s4968_s0 }
  0x2d   :  { %4139 = vmatmul.mubr.msk.f32.vlgmr.msra.gmra.mrb[0].mxu0 %vm79_vm0, %v5245_v49  ;;  %4174 = vmatmul.mubr.msk.f32.gmra.mrb[6].mxu1 %vm79_vm0, %v5228_v48 }
  0x2e   :  { %369 = vmatprep.mubr.f32.mxu0 %v4966_v3  ;;  %4419 = vmatpush1.bf16.msra.mxu0 %v5195_v45 }
  0x2f   :  { %417 = vmatprep.subr.mxu0 %v5192_v44  ;;  %1035 = vmatprep.mubr.f32.mxu1 %v4966_v3 }
  0x30   :  { %1396 = vperm.xlu0 %4900, %v57_v0   ;;  %1401 = vperm.xlu1 %4901, %v58_v8   ;;  %v5436_v0 = vld [vmem:[%s6231_s1 + $0xa0] sm:$0xff]  ;;  %v5481_v8 = vld [vmem:[%s6231_s1 + $0xb8] sm:$0xff] }
  0x31   :  { %4140 = vmatmul.mubr.msk.f32.gmra.mrb[2].mxu0 %vm79_vm0, %v5260_v50  ;;  %4175 = vmatmul.mubr.msk.f32.vlgmr.msra.gmra.mrb[0].mxu1 %vm79_vm0, %v5245_v49 }
  0x32   :  { %375 = vmatprep.mubr.f32.mxu0 %v4966_v3  ;;  %418 = vmatpush1.msra.mxu0 %v5215_v47 }
  0x33   :  { %1041 = vmatprep.mubr.f32.mxu1 %v4966_v3 }
  0x34   :  { %1406 = vperm.xlu1 %4901, %v59_v18  }
  0x35   :  { %4141 = vmatmul.mubr.msk.f32.gmra.mrb[4].mxu0 %vm79_vm0, %v5273_v51  ;;  %4176 = vmatmul.mubr.msk.f32.gmra.mrb[2].mxu1 %vm79_vm0, %v5260_v50 }
  0x36   :  { %381 = vmatprep.mubr.f32.mxu0 %v4966_v3  ;;  %1047 = vmatprep.mubr.f32.mxu1 %v4966_v3 }
  0x39   :  { %4142 = vmatmul.mubr.msk.f32.gmra.mrb[6].mxu0 %vm79_vm0, %v5285_v52  ;;  %4177 = vmatmul.mubr.msk.f32.gmra.mrb[4].mxu1 %vm79_vm0, %v5273_v51 }
  0x3a   :  { %477 = vmatprep.mubr.f32.mxu0 %v4966_v3  ;;  %1053 = vmatprep.mubr.f32.mxu1 %v4966_v3 }
  0x3d   :  { %4147 = vmatmul.mubr.msk.f32.vlgmr.msra.gmra.mrb[0].mxu0 %vm79_vm0, %v5296_v53  ;;  %4178 = vmatmul.mubr.msk.f32.gmra.mrb[6].mxu1 %vm79_vm0, %v5285_v52 }
  0x3e   :  { %483 = vmatprep.mubr.f32.mxu0 %v4966_v3  ;;  %1132 = vmatprep.mubr.f32.mxu1 %v4966_v3 }
  0x41   :  { %4148 = vmatmul.mubr.msk.f32.gmra.mrb[2].mxu0 %vm79_vm0, %v5307_v54 }
  0x42   :  { %489 = vmatprep.mubr.f32.mxu0 %v4966_v3 }
  0x45   :  { %4149 = vmatmul.mubr.msk.f32.gmra.mrb[4].mxu0 %vm79_vm0, %v5316_v55 }
  0x46   :  { %495 = vmatprep.mubr.f32.mxu0 %v4966_v3 }
  0x49   :  { %4150 = vmatmul.mubr.msk.f32.gmra.mrb[6].mxu0 %vm79_vm0, %v5324_v56 }
  0x4a   :  { %619 = vmatprep.mubr.f32.mxu0 %v4966_v3 }
  0x75   :  { %v530_v57 = vpop.permute.xlu1 %529 }
  0x76   :  { %v4852_v58 = vpop.permute.xlu0 %4851 }
  0x77   :  { %v4854_v59 = vunpack.i.h.bf16 %v4852_v58  ;;  %v4853_v60 = vunpack.i.l.bf16 %v4852_v58  ;;  %v60_v58 = vld [vmem:[%s6232_s2 + $0x18] sm:$0xff] }
  0x78   :  { %1411 = vperm.xlu0 %4900, %v60_v58  }
  0x79   :  { %v5329_v61 = vpop.permute.xlu1 %531  ;;  %v534_v4 = vsel %vm533_vm1, %v4853_v60, %v4854_v59 }
  0x7a   :  { %v4857_v62 = vpop.permute.xlu0 %4856  ;;  %v5363_v23 = vsel %vm533_vm1, %v530_v57, %v5329_v61 }
  0x7b   :  { %v4859_v1 = vunpack.i.h.bf16 %v4857_v62  ;;  %v4858_v2 = vunpack.i.l.bf16 %v4857_v62 }
  0x7d   :  { %v535_v5 = vsel %vm533_vm1, %v4858_v2, %v4859_v1  ;;  %v5336_v6 = vpack.c.bf16 %v4859_v1, %v4854_v59  ;;  %v4867_v7 = vpop.permute.xlu1 %4866  ;;  %v5419_v59 = vld [vmem:[%s6231_s1 + $0x98] sm:$0xff] }
  0x7e   :  { %v5341_v9 = vpack.c.bf16 %v535_v5, %v534_v4  ;;  %v4869_v10 = vunpack.i.h.bf16 %v4867_v7  ;;  %v4868_v11 = vunpack.i.l.bf16 %v4867_v7  ;;  %v4862_v12 = vpop.permute.xlu0 %4861  ;;  %v5449_v4 = vld [vmem:[%s6231_s1 + $0xa8] sm:$0xff]  ;;  %v5467_v7 = vld [vmem:[%s6231_s1 + $0xb0] sm:$0xff] }
  0x7f   :  { %4421 = vmatprep.subr.bf16.mxu0 %v5336_v6  ;;  %4441 = vmatprep.subr.bf16.mxu1 %v5336_v6  ;;  %v4864_v13 = vunpack.i.h.bf16 %v4862_v12  ;;  %v4863_v14 = vunpack.i.l.bf16 %v4862_v12 }
  0x80   :  { %4423 = vmatpush1.bf16.msra.mxu0 %v5341_v9  ;;  %4443 = vmatpush1.bf16.msra.mxu1 %v5341_v9  ;;  %v676_v15 = vsel %vm533_vm1, %v4868_v11, %v4869_v10 }
  0x81   :  { %559 = vmatprep.subr.mxu0 %v5329_v61  ;;  %1072 = vmatprep.subr.mxu1 %v5329_v61  ;;  %v675_v16 = vsel %vm533_vm1, %v4863_v14, %v4864_v13  ;;  %v5351_v17 = vpop.permute.xlu1 %673  ;;  %v5365_v24 = vpack.c.bf16 %v4869_v10, %v4864_v13 }
  0x82   :  { %v672_v22 = vpop.permute.xlu0 %671  ;;  %v5369_v25 = vpack.c.bf16 %v676_v15, %v675_v16  ;;  %v61_v15 = vlaneseq }
  0x83   :  { %v5392_v37 = vsel %vm533_vm1, %v672_v22, %v5351_v17 }
  0x84   :  { %560 = vmatpush1.msra.mxu0 %v5363_v23  ;;  %1073 = vmatpush1.msra.mxu1 %v5363_v23  ;;  %v5683_v18 = vand.u32 127, %v61_v15 }
  0x85   :  { %4155 = vmatmul.mubr.msk.f32.vlgmr.msra.gmra.mrb[0].mxu0 %vm79_vm0, %v5359_v20  ;;  %4179 = vmatmul.mubr.msk.f32.vlgmr.msra.gmra.mrb[0].mxu1 %vm79_vm0, %v5296_v53  ;;  %v4877_v28 = vpop.permute.xlu1 %4876 }
  0x86   :  { %625 = vmatprep.mubr.f32.mxu0 %v4966_v3  ;;  %1138 = vmatprep.mubr.f32.mxu1 %v4966_v3  ;;  %v4872_v32 = vpop.permute.xlu0 %4871  ;;  %v4879_v35 = vunpack.i.h.bf16 %v4877_v28  ;;  %v4878_v39 = vunpack.i.l.bf16 %v4877_v28  ;;  %vm64_vm3 = vcmp.eq.s32.totalorder %v5683_v18, 0 }
  0x87   :  { %4445 = vmatprep.subr.bf16.mxu1 %v5365_v24  ;;  %v4874_v36 = vunpack.i.h.bf16 %v4872_v32  ;;  %4425 = vmatprep.subr.bf16.mxu0 %v5365_v24  ;;  %v4873_v57 = vunpack.i.l.bf16 %v4872_v32  ;;  %vm4249_vm6 = vmneg %vm64_vm3 }
  0x88   :  { %4447 = vmatpush1.bf16.msra.mxu1 %v5369_v25  ;;  %4427 = vmatpush1.bf16.msra.mxu0 %v5369_v25  ;;  %v1281_v60 = vsel %vm533_vm1, %v4878_v39, %v4879_v35  ;;  %vm5771_vm8 = vmpackc.low %vm4249_vm6, %vm4249_vm6 }
  0x89   :  { %4156 = vmatmul.mubr.msk.f32.gmra.mrb[2].mxu0 %vm79_vm0, %v5380_v30  ;;  %4180 = vmatmul.mubr.msk.f32.gmra.mrb[2].mxu1 %vm79_vm0, %v5307_v54  ;;  %v5401_v40 = vpack.c.bf16 %v4879_v35, %v4874_v36  ;;  %v1280_v62 = vsel %vm533_vm1, %v4873_v57, %v4874_v36  ;;  %v5438_v1 = vpop.permute.xlu1 %1278 }
  0x8a   :  { %631 = vmatprep.mubr.f32.mxu0 %v4966_v3  ;;  %1144 = vmatprep.mubr.f32.mxu1 %v4966_v3  ;;  %v5429_v63 = vpack.c.bf16 %v1281_v60, %v1280_v62  ;;  %v1277_v2 = vpop.permute.xlu0 %1276 }
  0x8b   :  { %1169 = vmatprep.subr.mxu1 %v5351_v17  ;;  %700 = vmatprep.subr.mxu0 %v5351_v17  ;;  %v5453_v5 = vsel %vm533_vm1, %v1277_v2, %v5438_v1 }
  0x8c   :  { %1170 = vmatpush1.msra.mxu1 %v5392_v37  ;;  %701 = vmatpush1.msra.mxu0 %v5392_v37 }
  0x8d   :  { %4157 = vmatmul.mubr.msk.f32.gmra.mrb[4].mxu0 %vm79_vm0, %v5399_v38  ;;  %4181 = vmatmul.mubr.msk.f32.gmra.mrb[4].mxu1 %vm79_vm0, %v5316_v55 }
  0x8e   :  { %637 = vmatprep.mubr.f32.mxu0 %v4966_v3  ;;  %1150 = vmatprep.mubr.f32.mxu1 %v4966_v3 }
  0x8f   :  { %4449 = vmatprep.subr.bf16.mxu1 %v5401_v40  ;;  %4453 = vmatprep.subr.bf16.mxu0 %v5173_v42 }
  0x91   :  { %4158 = vmatmul.mubr.msk.f32.gmra.mrb[6].mxu0 %vm79_vm0, %v5419_v59  ;;  %4182 = vmatmul.mubr.msk.f32.gmra.mrb[6].mxu1 %vm79_vm0, %v5324_v56 }
  0x92   :  { %760 = vmatprep.mubr.f32.mxu0 %v4966_v3  ;;  %1229 = vmatprep.mubr.f32.mxu1 %v4966_v3 }
  0x95   :  { %4163 = vmatmul.mubr.msk.f32.vlgmr.msra.gmra.mrb[0].mxu0 %vm79_vm0, %v5436_v0  ;;  %4183 = vmatmul.mubr.msk.f32.vlgmr.msra.gmra.mrb[0].mxu1 %vm79_vm0, %v5359_v20 }
  0x96   :  { %4451 = vmatpush1.bf16.msra.mxu1 %v5429_v63  ;;  %766 = vmatprep.mubr.f32.mxu0 %v4966_v3 }
  0x97   :  { %1235 = vmatprep.mubr.f32.mxu1 %v4966_v3  ;;  %1293 = vmatprep.subr.mxu1 %v5438_v1 }
  0x98   :  { %4455 = vmatpush1.bf16.msra.mxu0 %v5195_v45 }
  0x99   :  { %4164 = vmatmul.mubr.msk.f32.gmra.mrb[2].mxu0 %vm79_vm0, %v5449_v4  ;;  %4184 = vmatmul.mubr.msk.f32.gmra.mrb[2].mxu1 %vm79_vm0, %v5380_v30 }
  0x9a   :  { %1294 = vmatpush1.msra.mxu1 %v5453_v5  ;;  %772 = vmatprep.mubr.f32.mxu0 %v4966_v3 }
  0x9b   :  { %4477 = vmatprep.subr.bf16.mxu1 %v5336_v6  ;;  %1241 = vmatprep.mubr.f32.mxu1 %v4966_v3 }
  0x9c   :  { %1442 = vmatprep.subr.mxu0 %v5192_v44 }
  0x9d   :  { %4165 = vmatmul.mubr.msk.f32.gmra.mrb[4].mxu0 %vm79_vm0, %v5467_v7  ;;  %4185 = vmatmul.mubr.msk.f32.gmra.mrb[4].mxu1 %vm79_vm0, %v5399_v38 }
  0x9e   :  { %778 = vmatprep.mubr.f32.mxu0 %v4966_v3  ;;  %1247 = vmatprep.mubr.f32.mxu1 %v4966_v3 }
  0x9f   :  { %1443 = vmatpush1.msra.mxu0 %v5215_v47 }
  0xa0   :  { %4457 = vmatprep.subr.bf16.mxu0 %v5077_v21  ;;  %v4882_v21 = vpop.permute.xlu0 %4881 }
  0xa1   :  { %4166 = vmatmul.mubr.msk.f32.gmra.mrb[6].mxu0 %vm79_vm0, %v5481_v8  ;;  %4186 = vmatmul.mubr.msk.f32.gmra.mrb[6].mxu1 %vm79_vm0, %v5419_v59 }
  0xa2   :  { %1353 = vmatprep.mubr.f32.mxu1 %v4966_v3  ;;  %1502 = vmatprep.mubr.f32.mxu0 %v4966_v3 }
  0xa5   :  { %4187 = vmatmul.mubr.msk.f32.vlgmr.msra.gmra.mrb[0].mxu1 %vm79_vm0, %v5436_v0  ;;  %4191 = vmatmul.mubr.msk.f32.vlgmr.msra.gmra.mrb[8].mxu0 %vm79_vm0, %v5093_v27 }
  0xa6   :  { %4459 = vmatpush1.bf16.msra.mxu0 %v5073_v19  ;;  %4479 = vmatpush1.bf16.msra.mxu1 %v5341_v9  ;;  %v4887_v19 = vpop.permute.xlu1 %4886 }
  0xa7   :  { %2035 = vmatprep.subr.mxu1 %v5329_v61  ;;  %1359 = vmatprep.mubr.f32.mxu1 %v4966_v3 }
  0xa8   :  { %1508 = vmatprep.mubr.f32.mxu0 %v4966_v3  ;;  %1531 = vmatprep.subr.mxu0 %v5088_v26  ;;  %v4889_v26 = vunpack.i.h.bf16 %v4887_v19 }
  0xa9   :  { %4188 = vmatmul.mubr.msk.f32.gmra.mrb[2].mxu1 %vm79_vm0, %v5449_v4  ;;  %4192 = vmatmul.mubr.msk.f32.gmra.mrb[10].mxu0 %vm79_vm0, %v5108_v29 }
  0xaa   :  { %1532 = vmatpush1.msra.mxu0 %v5114_v31  ;;  %2036 = vmatpush1.msra.mxu1 %v5363_v23  ;;  %v4888_v31 = vunpack.i.l.bf16 %v4887_v19 }
  0xab   :  { %4461 = vmatprep.subr.bf16.mxu0 %v5336_v6  ;;  %1365 = vmatprep.mubr.f32.mxu1 %v4966_v3 }
  0xac   :  { %1514 = vmatprep.mubr.f32.mxu0 %v4966_v3  ;;  %4481 = vmatprep.subr.bf16.mxu1 %v5173_v42  ;;  %v1926_v42 = vsel %vm533_vm1, %v4888_v31, %v4889_v26 }
  0xad   :  { %4189 = vmatmul.mubr.msk.f32.gmra.mrb[4].mxu1 %vm79_vm0, %v5467_v7  ;;  %4193 = vmatmul.mubr.msk.f32.gmra.mrb[12].mxu0 %vm79_vm0, %v5127_v33 }
  0xae   :  { %1371 = vmatprep.mubr.f32.mxu1 %v4966_v3  ;;  %1520 = vmatprep.mubr.f32.mxu0 %v4966_v3 }
  0xb1   :  { %4190 = vmatmul.mubr.msk.f32.gmra.mrb[6].mxu1 %vm79_vm0, %v5481_v8  ;;  %4194 = vmatmul.mubr.msk.f32.gmra.mrb[14].mxu0 %vm79_vm0, %v5142_v34 }
  0xb2   :  { %1591 = vmatprep.mubr.f32.mxu0 %v4966_v3  ;;  %2095 = vmatprep.mubr.f32.mxu1 %v4966_v3 }
  0xb5   :  { %4195 = vmatmul.mubr.msk.f32.vlgmr.msra.gmra.mrb[8].mxu0 %vm79_vm0, %v5169_v41  ;;  %4215 = vmatmul.mubr.msk.f32.vlgmr.msra.gmra.mrb[8].mxu1 %vm79_vm0, %v5093_v27  ;;  %v4884_v27 = vunpack.i.h.bf16 %v4882_v21 }
  0xb6   :  { %4463 = vmatpush1.bf16.msra.mxu0 %v5341_v9  ;;  %4483 = vmatpush1.bf16.msra.mxu1 %v5195_v45 }
  0xb7   :  { %1620 = vmatprep.subr.mxu0 %v5329_v61  ;;  %1597 = vmatprep.mubr.f32.mxu0 %v4966_v3 }
  0xb8   :  { %2101 = vmatprep.mubr.f32.mxu1 %v4966_v3  ;;  %2124 = vmatprep.subr.mxu1 %v5192_v44 }
  0xb9   :  { %4196 = vmatmul.mubr.msk.f32.gmra.mrb[10].mxu0 %vm79_vm0, %v5184_v43  ;;  %4216 = vmatmul.mubr.msk.f32.gmra.mrb[10].mxu1 %vm79_vm0, %v5108_v29  ;;  %v4472_v29 = vpack.c.bf16 %v4889_v26, %v4884_v27 }
  0xba   :  { %1621 = vmatpush1.msra.mxu0 %v5363_v23  ;;  %2125 = vmatpush1.msra.mxu1 %v5215_v47 }
  0xbb   :  { %4465 = vmatprep.subr.bf16.mxu0 %v5365_v24  ;;  %4485 = vmatprep.subr.bf16.mxu1 %v5365_v24 }
  0xbc   :  { %1603 = vmatprep.mubr.f32.mxu0 %v4966_v3  ;;  %2107 = vmatprep.mubr.f32.mxu1 %v4966_v3 }
  0xbd   :  { %4197 = vmatmul.mubr.msk.f32.gmra.mrb[12].mxu0 %vm79_vm0, %v5207_v46  ;;  %4217 = vmatmul.mubr.msk.f32.gmra.mrb[12].mxu1 %vm79_vm0, %v5127_v33  ;;  %v4883_v33 = vunpack.i.l.bf16 %v4882_v21 }
  0xbe   :  { %1609 = vmatprep.mubr.f32.mxu0 %v4966_v3  ;;  %2113 = vmatprep.mubr.f32.mxu1 %v4966_v3 }
  0xc1   :  { %4198 = vmatmul.mubr.msk.f32.gmra.mrb[14].mxu0 %vm79_vm0, %v5228_v48  ;;  %4218 = vmatmul.mubr.msk.f32.gmra.mrb[14].mxu1 %vm79_vm0, %v5142_v34  ;;  %v1924_v34 = vpop.permute.xlu1 %1923 }
  0xc2   :  { %1680 = vmatprep.mubr.f32.mxu0 %v4966_v3  ;;  %2184 = vmatprep.mubr.f32.mxu1 %v4966_v3 }
  0xc5   :  { %4199 = vmatmul.mubr.msk.f32.vlgmr.msra.gmra.mrb[8].mxu0 %vm79_vm0, %v5245_v49  ;;  %4219 = vmatmul.mubr.msk.f32.vlgmr.msra.gmra.mrb[8].mxu1 %vm79_vm0, %v5169_v41  ;;  %v1922_v41 = vpop.permute.xlu0 %1921  ;;  %v4897_v44 = vpop.permute.xlu1 %4896 }
  0xc6   :  { %4467 = vmatpush1.bf16.msra.mxu0 %v5369_v25  ;;  %4487 = vmatpush1.bf16.msra.mxu1 %v5369_v25  ;;  %v4899_v47 = vunpack.i.h.bf16 %v4897_v44  ;;  %v5688_v25 = vadd.s32 128, %v5683_v18  ;;  %v5810_v18 = vld [vmem:[%s6233_s3 + $0x40] sm:$0xff] }
  0xc7   :  { %1717 = vmatprep.subr.mxu0 %v5351_v17  ;;  %2213 = vmatprep.subr.mxu1 %v5351_v17 }
  0xc8   :  { %1686 = vmatprep.mubr.f32.mxu0 %v4966_v3  ;;  %2190 = vmatprep.mubr.f32.mxu1 %v4966_v3  ;;  %vm67_vm4 = vcmp.eq.s32.totalorder %v5688_v25, 251  ;;  %v5826_v25 = vld [vmem:[%s6233_s3 + $0x48] sm:$0xff] }
  0xc9   :  { %4200 = vmatmul.mubr.msk.f32.gmra.mrb[10].mxu0 %vm79_vm0, %v5260_v50  ;;  %4220 = vmatmul.mubr.msk.f32.gmra.mrb[10].mxu1 %vm79_vm0, %v5184_v43  ;;  %v1925_v43 = vsel %vm533_vm1, %v4883_v33, %v4884_v27  ;;  %v4892_v45 = vpop.permute.xlu0 %4891  ;;  %v2511_v61 = vpop.permute.xlu1 %2510  ;;  %vm4247_vm5 = vmneg %vm67_vm4 }
  0xca   :  { %1718 = vmatpush1.msra.mxu0 %v5392_v37  ;;  %2214 = vmatpush1.msra.mxu1 %v5392_v37  ;;  %vm5762_vm7 = vmpackc.low %vm4247_vm5, %vm4247_vm5 }
  0xcb   :  { %4469 = vmatprep.subr.bf16.mxu0 %v5401_v40  ;;  %4489 = vmatprep.subr.bf16.mxu1 %v5401_v40 }
  0xcc   :  { %1692 = vmatprep.mubr.f32.mxu0 %v4966_v3  ;;  %2196 = vmatprep.mubr.f32.mxu1 %v4966_v3 }
  0xcd   :  { %4201 = vmatmul.mubr.msk.f32.gmra.mrb[12].mxu0 %vm79_vm0, %v5273_v51  ;;  %4221 = vmatmul.mubr.msk.f32.gmra.mrb[12].mxu1 %vm79_vm0, %v5207_v46  ;;  %v4474_v46 = vpack.c.bf16 %v1926_v42, %v1925_v43  ;;  %v2509_v6 = vpop.permute.xlu0 %2508 }
  0xce   :  { %1698 = vmatprep.mubr.f32.mxu0 %v4966_v3  ;;  %2202 = vmatprep.mubr.f32.mxu1 %v4966_v3 }
  0xd1   :  { %4202 = vmatmul.mubr.msk.f32.gmra.mrb[14].mxu0 %vm79_vm0, %v5285_v52  ;;  %4222 = vmatmul.mubr.msk.f32.gmra.mrb[14].mxu1 %vm79_vm0, %v5228_v48  ;;  %v4894_v48 = vunpack.i.h.bf16 %v4892_v45  ;;  %v5685_v22 = vpop.permute.xlu0 %1396 }
  0xd2   :  { %1777 = vmatprep.mubr.f32.mxu0 %v4966_v3  ;;  %2273 = vmatprep.mubr.f32.mxu1 %v4966_v3 }
  0xd5   :  { %4203 = vmatmul.mubr.msk.f32.vlgmr.msra.gmra.mrb[8].mxu0 %vm79_vm0, %v5296_v53  ;;  %4223 = vmatmul.mubr.msk.f32.vlgmr.msra.gmra.mrb[8].mxu1 %vm79_vm0, %v5245_v49  ;;  %v1927_v49 = vsel %vm533_vm1, %v1922_v41, %v1924_v34 }
  0xd6   :  { %4471 = vmatpush1.bf16.msra.mxu0 %v5429_v63  ;;  %4491 = vmatpush1.bf16.msra.mxu1 %v5429_v63 }
  0xd7   :  { %1814 = vmatprep.subr.mxu0 %v5438_v1  ;;  %2310 = vmatprep.subr.mxu1 %v5438_v1 }
  0xd8   :  { %1783 = vmatprep.mubr.f32.mxu0 %v4966_v3  ;;  %2279 = vmatprep.mubr.f32.mxu1 %v4966_v3 }
  0xd9   :  { %4204 = vmatmul.mubr.msk.f32.gmra.mrb[10].mxu0 %vm79_vm0, %v5307_v54  ;;  %4224 = vmatmul.mubr.msk.f32.gmra.mrb[10].mxu1 %vm79_vm0, %v5260_v50  ;;  %v4496_v50 = vpack.c.bf16 %v4899_v47, %v4894_v48 }
  0xda   :  { %1815 = vmatpush1.msra.mxu0 %v5453_v5  ;;  %2311 = vmatpush1.msra.mxu1 %v5453_v5 }
  0xdb   :  { %1789 = vmatprep.mubr.f32.mxu0 %v4966_v3  ;;  %2285 = vmatprep.mubr.f32.mxu1 %v4966_v3 }
  0xdc   :  { %4473 = vmatprep.subr.bf16.mxu0 %v4472_v29  ;;  %4493 = vmatprep.subr.bf16.mxu1 %v4472_v29 }
  0xdd   :  { %4205 = vmatmul.mubr.msk.f32.gmra.mrb[12].mxu0 %vm79_vm0, %v5316_v55  ;;  %4225 = vmatmul.mubr.msk.f32.gmra.mrb[12].mxu1 %vm79_vm0, %v5273_v51  ;;  %v4898_v51 = vunpack.i.l.bf16 %v4897_v44 }
  0xde   :  { %1795 = vmatprep.mubr.f32.mxu0 %v4966_v3  ;;  %2291 = vmatprep.mubr.f32.mxu1 %v4966_v3 }
  0xe1   :  { %4206 = vmatmul.mubr.msk.f32.gmra.mrb[14].mxu0 %vm79_vm0, %v5324_v56  ;;  %4226 = vmatmul.mubr.msk.f32.gmra.mrb[14].mxu1 %vm79_vm0, %v5285_v52  ;;  %v4893_v52 = vunpack.i.l.bf16 %v4892_v45 }
  0xe2   :  { %1874 = vmatprep.mubr.f32.mxu0 %v4966_v3  ;;  %2370 = vmatprep.mubr.f32.mxu1 %v4966_v3 }
  0xe5   :  { %4207 = vmatmul.mubr.msk.f32.vlgmr.msra.gmra.mrb[8].mxu0 %vm79_vm0, %v5359_v20  ;;  %4227 = vmatmul.mubr.msk.f32.vlgmr.msra.gmra.mrb[8].mxu1 %vm79_vm0, %v5296_v53  ;;  %v2514_v53 = vsel %vm2512_vm2, %v4898_v51, %v4899_v47 }
  0xe6   :  { %1880 = vmatprep.mubr.f32.mxu0 %v4966_v3  ;;  %2376 = vmatprep.mubr.f32.mxu1 %v4966_v3 }
  0xe7   :  { %4475 = vmatpush1.bf16.msra.mxu0 %v4474_v46  ;;  %4495 = vmatpush1.bf16.msra.mxu1 %v4474_v46 }
  0xe8   :  { %1938 = vmatprep.subr.mxu0 %v1924_v34  ;;  %2407 = vmatprep.subr.mxu1 %v1924_v34 }
  0xe9   :  { %4208 = vmatmul.mubr.msk.f32.gmra.mrb[10].mxu0 %vm79_vm0, %v5380_v30  ;;  %4228 = vmatmul.mubr.msk.f32.gmra.mrb[10].mxu1 %vm79_vm0, %v5307_v54  ;;  %v2513_v54 = vsel %vm2512_vm2, %v4893_v52, %v4894_v48 }
  0xea   :  { %1886 = vmatprep.mubr.f32.mxu0 %v4966_v3  ;;  %2382 = vmatprep.mubr.f32.mxu1 %v4966_v3 }
  0xeb   :  { %1939 = vmatpush1.msra.mxu0 %v1927_v49  ;;  %2408 = vmatpush1.msra.mxu1 %v1927_v49 }
  0xec   :  { %4497 = vmatprep.subr.bf16.mxu1 %v4496_v50 }
  0xed   :  { %4209 = vmatmul.mubr.msk.f32.gmra.mrb[12].mxu0 %vm79_vm0, %v5399_v38  ;;  %4229 = vmatmul.mubr.msk.f32.gmra.mrb[12].mxu1 %vm79_vm0, %v5316_v55  ;;  %v4498_v55 = vpack.c.bf16 %v2514_v53, %v2513_v54 }
  0xee   :  { %1892 = vmatprep.mubr.f32.mxu0 %v4966_v3  ;;  %2388 = vmatprep.mubr.f32.mxu1 %v4966_v3 }
  0xf1   :  { %4210 = vmatmul.mubr.msk.f32.gmra.mrb[14].mxu0 %vm79_vm0, %v5419_v59  ;;  %4230 = vmatmul.mubr.msk.f32.gmra.mrb[14].mxu1 %vm79_vm0, %v5324_v56  ;;  %v2515_v56 = vsel %vm2512_vm2, %v2509_v6, %v2511_v61 }
  0xf2   :  { %1998 = vmatprep.mubr.f32.mxu0 %v4966_v3  ;;  %2467 = vmatprep.mubr.f32.mxu1 %v4966_v3 }
  0xf5   :  { %4211 = vmatmul.mubr.msk.f32.vlgmr.msra.gmra.mrb[8].mxu0 %vm79_vm0, %v5436_v0  ;;  %4231 = vmatmul.mubr.msk.f32.vlgmr.msra.gmra.mrb[8].mxu1 %vm79_vm0, %v5359_v20 }
  0xf6   :  { %2004 = vmatprep.mubr.f32.mxu0 %v4966_v3  ;;  %2473 = vmatprep.mubr.f32.mxu1 %v4966_v3 }
  0xf7   :  { %4499 = vmatpush1.bf16.msra.mxu1 %v4498_v55  ;;  %v5714_v31 = vpop.permute.xlu0 %1411 }
  0xf8   :  { %2526 = vmatprep.subr.mxu1 %v2511_v61 }
  0xf9   :  { %4212 = vmatmul.mubr.msk.f32.gmra.mrb[10].mxu0 %vm79_vm0, %v5449_v4  ;;  %4232 = vmatmul.mubr.msk.f32.gmra.mrb[10].mxu1 %vm79_vm0, %v5380_v30  ;;  %v5690_v30 = vpop.permute.xlu1 %1401 }
  0xfa   :  { %2010 = vmatprep.mubr.f32.mxu0 %v4966_v3  ;;  %2479 = vmatprep.mubr.f32.mxu1 %v4966_v3 }
  0xfb   :  { %2527 = vmatpush1.msra.mxu1 %v2515_v56 }
  0xfd   :  { %4213 = vmatmul.mubr.msk.f32.gmra.mrb[12].mxu0 %vm79_vm0, %v5467_v7  ;;  %4233 = vmatmul.mubr.msk.f32.gmra.mrb[12].mxu1 %vm79_vm0, %v5399_v38  ;;  %v5700_v63 = vpop.permute.xlu1 %1406 }
  0xfe   :  { %2016 = vmatprep.mubr.f32.mxu0 %v4966_v3  ;;  %2485 = vmatprep.mubr.f32.mxu1 %v4966_v3 }
 0x101   :  { %4214 = vmatmul.mubr.msk.f32.gmra.mrb[14].mxu0 %vm79_vm0, %v5481_v8  ;;  %4234 = vmatmul.mubr.msk.f32.gmra.mrb[14].mxu1 %vm79_vm0, %v5419_v59 }
 0x102   :  { %2586 = vmatprep.mubr.f32.mxu1 %v4966_v3  ;;  %2757 = vmatprep.mubr.f32.mxu0 %v4966_v3 }
 0x105   :  { %4235 = vmatmul.mubr.msk.f32.vlgmr.msra.gmra.mrb[8].mxu1 %vm79_vm0, %v5436_v0 }
 0x106   :  { %2592 = vmatprep.mubr.f32.mxu1 %v4966_v3 }
 0x109   :  { %4236 = vmatmul.mubr.msk.f32.gmra.mrb[10].mxu1 %vm79_vm0, %v5449_v4 }
 0x10a   :  { %2598 = vmatprep.mubr.f32.mxu1 %v4966_v3 }
 0x10d   :  { %4237 = vmatmul.mubr.msk.f32.gmra.mrb[12].mxu1 %vm79_vm0, %v5467_v7 }
 0x10e   :  { %2604 = vmatprep.mubr.f32.mxu1 %v4966_v3 }
 0x111   :  { %4238 = vmatmul.mubr.msk.f32.gmra.mrb[14].mxu1 %vm79_vm0, %v5481_v8 }
 0x112   :  { %3403 = vmatprep.mubr.f32.mxu1 %v4966_v3 }
 0x168   :  { %v762_v9 = vpop.f32.mrb[0].mxu0 }
 0x169   :  { %v764_v10 = vpop.f32.mrb[1].mxu0 }
 0x16c   :  { %v768_v11 = vpop.f32.mrb[2].mxu0 }
 0x16d   :  { %v770_v12 = vpop.f32.mrb[3].mxu0 }
 0x170   :  { %v774_v13 = vpop.f32.mrb[4].mxu0 }
 0x171   :  { %v776_v14 = vpop.f32.mrb[5].mxu0 }
 0x174   :  { %v780_v16 = vpop.f32.mrb[6].mxu0 }
 0x175   :  { %v782_v17 = vpop.f32.mrb[7].mxu0 }
 0x178   :  { %v1355_v20 = vpop.f32.mrb[0].mxu1 }
 0x179   :  { %v1386_v23 = vmax.f32 %v762_v9, %v1355_v20  ;;  %v1357_v24 = vpop.f32.mrb[1].mxu1 }
 0x17a   :  { %v1387_v28 = vmax.f32 %v764_v10, %v1357_v24 }
 0x17b   :  { %v1414_v32 = vadd.f32 %v5685_v22, %v1386_v23 }
 0x17c   :  { %v1415_v35 = vadd.f32 %v5685_v22, %v1387_v28  ;;  %v1361_v36 = vpop.f32.mrb[2].mxu1 }
 0x17d   :  { %v1422_v37 = vmax.f32 %v1414_v32, 0.0  ;;  %v1388_v38 = vmax.f32 %v768_v11, %v1361_v36  ;;  %v1363_v39 = vpop.f32.mrb[3].mxu1 }
 0x17e   :  { %v1423_v40 = vmax.f32 %v1415_v35, 0.0  ;;  %v1389_v57 = vmax.f32 %v770_v12, %v1363_v39 }
 0x17f   :  { %v1416_v58 = vadd.f32 %v5690_v30, %v1388_v38  ;;  %v1430_v59 = vsel %vm64_vm3, 0.0, %v1422_v37 }
 0x180   :  { %v1417_v60 = vadd.f32 %v5690_v30, %v1389_v57  ;;  %v1367_v62 = vpop.f32.mrb[4].mxu1  ;;  %v1431_v0 = vsel %vm67_vm4, 0.0, %v1423_v40 }
 0x181   :  { %v1424_v1 = vmax.f32 %v1416_v58, 0.0  ;;  %v1390_v2 = vmax.f32 %v774_v13, %v1367_v62  ;;  %v1369_v4 = vpop.f32.mrb[5].mxu1  ;;  %v5704_v5 = vpack.i.bf16 %v1431_v0, %v1430_v59 }
 0x182   :  { %v1425_v7 = vmax.f32 %v1417_v60, 0.0  ;;  %v1391_v8 = vmax.f32 %v776_v14, %v1369_v4 }
 0x183   :  { %v5706_v19 = vpack.c.bf16 %v1424_v1, %v1422_v37  ;;  %v1418_v21 = vadd.f32 %v5700_v63, %v1390_v2  ;;  %4903 = vrot.lane.b32.xlu1 %v5704_v5, %s4967_s15  ;;  %v1432_v26 = vsel %vm64_vm3, 0.0, %v1424_v1 }
 0x184   :  { %v1419_v27 = vadd.f32 %v5700_v63, %v1391_v8  ;;  %v1373_v29 = vpop.f32.mrb[6].mxu1  ;;  %v1433_v33 = vsel %vm67_vm4, 0.0, %v1425_v7  ;;  %v5718_v34 = vpack.c.bf16 %v1425_v7, %v1423_v40 }
 0x185   :  { %v1426_v41 = vmax.f32 %v1418_v21, 0.0  ;;  %v1392_v42 = vmax.f32 %v780_v16, %v1373_v29  ;;  %v1375_v43 = vpop.f32.mrb[7].mxu1  ;;  %v5720_v44 = vpack.i.bf16 %v1433_v33, %v1432_v26  ;;  %v2653_v21 = vld [vmem:[%s6233_s3 + $0x10] sm:$0xff] }
 0x186   :  { %v1427_v45 = vmax.f32 %v1419_v27, 0.0  ;;  %v1393_v46 = vmax.f32 %v782_v17, %v1375_v43 }
 0x187   :  { %v1420_v47 = vadd.f32 %v5714_v31, %v1392_v42  ;;  %4908 = vrot.lane.b32.xlu0 %v5720_v44, %s4967_s15  ;;  %v1434_v48 = vsel %vm64_vm3, 0.0, %v1426_v41 }
 0x188   :  { %v1421_v49 = vadd.f32 %v5714_v31, %v1393_v46  ;;  %v1435_v50 = vsel %vm67_vm4, 0.0, %v1427_v45 }
 0x189   :  { %v1428_v51 = vmax.f32 %v1420_v47, 0.0  ;;  %v5730_v52 = vpack.i.bf16 %v1435_v50, %v1434_v48 }
 0x18a   :  { %v1429_v53 = vmax.f32 %v1421_v49, 0.0 }
 0x18b   :  { %v5732_v54 = vpack.c.bf16 %v1428_v51, %v1426_v41  ;;  %4913 = vrot.lane.b32.xlu1 %v5730_v52, %s4967_s15  ;;  %v1436_v55 = vsel %vm64_vm3, 0.0, %v1428_v51  ;;  %v2658_v41 = vld [vmem:[%s6233_s3 + $0x38] sm:$0xff] }
 0x18c   :  { %v1437_v61 = vsel %vm67_vm4, 0.0, %v1429_v53  ;;  %v5740_v6 = vpack.c.bf16 %v1429_v53, %v1427_v45 }
 0x18d   :  { %v5742_v56 = vpack.i.bf16 %v1437_v61, %v1436_v55 }
 0x18f   :  { %4918 = vrot.lane.b32.xlu0 %v5742_v56, %s4967_s15 }
 0x1c8   :  { %v2000_v9 = vpop.f32.mrb[8].mxu0 }
 0x1c9   :  { %v2002_v10 = vpop.f32.mrb[9].mxu0 }
 0x1cc   :  { %v2006_v11 = vpop.f32.mrb[10].mxu0 }
 0x1cd   :  { %v2008_v12 = vpop.f32.mrb[11].mxu0 }
 0x1d0   :  { %v2012_v13 = vpop.f32.mrb[12].mxu0 }
 0x1d1   :  { %v2014_v14 = vpop.f32.mrb[13].mxu0 }
 0x1d4   :  { %v2018_v15 = vpop.f32.mrb[14].mxu0 }
 0x1d5   :  { %v2020_v16 = vpop.f32.mrb[15].mxu0 }
 0x1d8   :  { %v2588_v17 = vpop.f32.mrb[8].mxu1 }
 0x1d9   :  { %v2619_v20 = vmax.f32 %v2000_v9, %v2588_v17  ;;  %v2590_v23 = vpop.f32.mrb[9].mxu1 }
 0x1da   :  { %v2620_v24 = vmax.f32 %v2002_v10, %v2590_v23 }
 0x1db   :  { %v2627_v28 = vadd.f32 %v2619_v20, %v5685_v22 }
 0x1dc   :  { %v2628_v32 = vadd.f32 %v2620_v24, %v5685_v22  ;;  %v2594_v35 = vpop.f32.mrb[10].mxu1  ;;  %v3871_v24 = vld [vmem:[%s6234_s4 + $0x20] sm:$0xff] }
 0x1dd   :  { %v2635_v36 = vmax.f32 %v2627_v28, 0.0  ;;  %v2621_v37 = vmax.f32 %v2006_v11, %v2594_v35  ;;  %v2596_v38 = vpop.f32.mrb[11].mxu1  ;;  %v3870_v35 = vld [vmem:[%s6234_s4 + $0x18] sm:$0xff] }
 0x1de   :  { %v2636_v39 = vmax.f32 %v2628_v32, 0.0  ;;  %v2622_v40 = vmax.f32 %v2008_v12, %v2596_v38 }
 0x1df   :  { %v2629_v57 = vadd.f32 %v2621_v37, %v5690_v30  ;;  %v2643_v58 = vsel %vm64_vm3, 0.0, %v2635_v36 }
 0x1e0   :  { %v2630_v59 = vadd.f32 %v2622_v40, %v5690_v30  ;;  %v2600_v60 = vpop.f32.mrb[12].mxu1  ;;  %v2644_v62 = vsel %vm67_vm4, 0.0, %v2636_v39 }
 0x1e1   :  { %v2637_v22 = vmax.f32 %v2629_v57, 0.0  ;;  %v2623_v0 = vmax.f32 %v2012_v13, %v2600_v60  ;;  %v2602_v1 = vpop.f32.mrb[13].mxu1  ;;  %v4922_v2 = vpack.i.bf16 %v2644_v62, %v2643_v58  ;;  %v3872_v57 = vld [vmem:[%s6234_s4 + $0x28] sm:$0xff] }
 0x1e2   :  { %v2638_v4 = vmax.f32 %v2630_v59, 0.0  ;;  %v2624_v7 = vmax.f32 %v2014_v14, %v2602_v1  ;;  %v4244_v60 = vld [vmem:[%s6233_s3 + $0x68] sm:$0xff] }
 0x1e3   :  { %v5758_v8 = vpack.c.bf16 %v2637_v22, %v2635_v36  ;;  %v2631_v30 = vadd.f32 %v2623_v0, %v5700_v63  ;;  %4923 = vrot.lane.b32.xlu1 %v4922_v2, %s4967_s15  ;;  %v2645_v26 = vsel %vm64_vm3, 0.0, %v2637_v22  ;;  %v4243_v36 = vld [vmem:[%s6233_s3 + $0x60] sm:$0xff]  ;;  %v3874_v2 = vld [vmem:[%s6234_s4 + $0x38] sm:$0xff] }
 0x1e4   :  { %v5768_v27 = vpack.c.bf16 %v2638_v4, %v2636_v39  ;;  %v2632_v29 = vadd.f32 %v2624_v7, %v5700_v63  ;;  %v2606_v33 = vpop.f32.mrb[14].mxu1  ;;  %v2646_v42 = vsel %vm67_vm4, 0.0, %v2638_v4  ;;  %v3873_v39 = vld [vmem:[%s6234_s4 + $0x30] sm:$0xff]  ;;  %v4246_v7 = vld [vmem:[%s6233_s3 + $0x78] sm:$0xff] }
 0x1e5   :  { %v2639_v43 = vmax.f32 %v2631_v30, 0.0  ;;  %v2625_v45 = vmax.f32 %v2018_v15, %v2606_v33  ;;  %v2608_v46 = vpop.f32.mrb[15].mxu1  ;;  %v4927_v47 = vpack.i.bf16 %v2646_v42, %v2645_v26  ;;  %v4245_v4 = vld [vmem:[%s6233_s3 + $0x70] sm:$0xff]  ;;  %v2652_v30 = vld [vmem:[%s6233_s3 + $0x8] sm:$0xff]  ;;  %v2654_v26 = vld [vmem:[%s6233_s3 + $0x18] sm:$0xff] }
 0x1e6   :  { %v2640_v48 = vmax.f32 %v2632_v29, 0.0  ;;  %v2626_v49 = vmax.f32 %v2020_v16, %v2608_v46  ;;  %4502 = vmatprep.subr.msk.bf16.mxu0 %vm5762_vm7, %v5768_v27  ;;  %v2656_v29 = vld [vmem:[%s6233_s3 + $0x28] sm:$0xff]  ;;  %v2657_v33 = vld [vmem:[%s6233_s3 + $0x30] sm:$0xff]  ;;  %v5980_v42 = vld [vmem:[%s6233_s3 + $0x80] sm:$0xff] }
 0x1e7   :  { %v2633_v63 = vadd.f32 %v2625_v45, %v5714_v31  ;;  %4505 = vmatpush1.bf16.msk.msra.mxu0 %vm5771_vm8, %v5758_v8  ;;  %4928 = vrot.lane.b32.xlu0 %v4927_v47, %s4967_s15  ;;  %v2647_v50 = vsel %vm64_vm3, 0.0, %v2639_v43  ;;  %v6000_v45 = vld [vmem:[%s6233_s3 + $0x90] sm:$0xff]  ;;  %v6010_v46 = vld [vmem:[%s6233_s3 + $0x98] sm:$0xff]  ;;  %v6020_v47 = vld [vmem:[%s6233_s3 + $0xa0] sm:$0xff] }
 0x1e8   :  { %v2634_v51 = vadd.f32 %v2626_v49, %v5714_v31  ;;  %v2648_v53 = vsel %vm67_vm4, 0.0, %v2640_v48  ;;  %v6040_v49 = vld [vmem:[%s6233_s3 + $0xb0] sm:$0xff] }
 0x1e9   :  { %v2641_v55 = vmax.f32 %v2633_v63, 0.0  ;;  %v4932_v61 = vpack.i.bf16 %v2648_v53, %v2647_v50  ;;  %v6049_v63 = vld [vmem:[%s6233_s3 + $0xb8] sm:$0xff] }
 0x1ea   :  { %v2642_v9 = vmax.f32 %v2634_v51, 0.0 }
 0x1eb   :  { %v5790_v10 = vpack.c.bf16 %v2641_v55, %v2639_v43  ;;  %4933 = vrot.lane.b32.xlu1 %v4932_v61, %s4967_s15  ;;  %v2649_v11 = vsel %vm64_vm3, 0.0, %v2641_v55  ;;  %v5990_v43 = vld [vmem:[%s6233_s3 + $0x88] sm:$0xff] }
 0x1ec   :  { %v5795_v12 = vpack.c.bf16 %v2642_v9, %v2640_v48  ;;  %v2650_v13 = vsel %vm67_vm4, 0.0, %v2642_v9  ;;  %v6030_v48 = vld [vmem:[%s6233_s3 + $0xa8] sm:$0xff] }
 0x1ed   :  { %v4937_v14 = vpack.i.bf16 %v2650_v13, %v2649_v11 }
 0x1ee   :  { %4508 = vmatprep.subr.msk.bf16.mxu0 %vm5762_vm7, %v5795_v12 }
 0x1ef   :  { %4943 = vrot.lane.b32.xlu1 %v5704_v5, %s4968_s0  ;;  %4511 = vmatpush1.bf16.msk.msra.mxu0 %vm5771_vm8, %v5790_v10  ;;  %v3867_v5 = vld [vmem:[%s6234_s4] sm:$0xff] }
 0x1f0   :  { %4938 = vrot.lane.b32.xlu0 %v4937_v14, %s4967_s15  ;;  %4514 = vmatprep.subr.msk.bf16.mxu0 %vm5762_vm7, %v5718_v34 }
 0x1f2   :  { %4263 = vmatmul.mubr.msk.f32.vlgmr.msra.gmra.mrb[16].mxu0 %vm2668_vm9, %v5810_v18 }
 0x1f3   :  { %4953 = vrot.lane.b32.xlu1 %v5730_v52, %s4968_s0  ;;  %4517 = vmatpush1.bf16.msk.msra.mxu0 %vm5771_vm8, %v5706_v19  ;;  %v5845_v19 = vld [vmem:[%s6233_s3 + $0x50] sm:$0xff] }
 0x1f4   :  { %4948 = vrot.lane.b32.xlu0 %v5720_v44, %s4968_s0  ;;  %4520 = vmatprep.subr.msk.bf16.mxu0 %vm5762_vm7, %v5740_v6  ;;  %v3869_v52 = vld [vmem:[%s6234_s4 + $0x10] sm:$0xff] }
 0x1f5   :  { %v4904_v31 = vpop.permute.xlu1 %4903  ;;  %2763 = vmatprep.mubr.f32.mxu0 %v4966_v3 }
 0x1f6   :  { %4264 = vmatmul.mubr.msk.f32.gmra.mrb[18].mxu0 %vm2668_vm9, %v5826_v25  ;;  %v4906_v34 = vunpack.i.h.bf16 %v4904_v31  ;;  %v4905_v44 = vunpack.i.l.bf16 %v4904_v31 }
 0x1f7   :  { %3877 = vperm.xlu1 %4901, %v3867_v5   ;;  %4523 = vmatpush1.bf16.msk.msra.mxu0 %vm5771_vm8, %v5732_v54  ;;  %v3868_v54 = vld [vmem:[%s6234_s4 + $0x8] sm:$0xff] }
 0x1f8   :  { %4958 = vrot.lane.b32.xlu0 %v5742_v56, %s4968_s0  ;;  %2769 = vmatprep.mubr.f32.mxu0 %v4966_v3  ;;  %v4242_v56 = vld [vmem:[%s6233_s3 + $0x58] sm:$0xff]  ;;  %v2976_v17 = vsel %vm533_vm1, %v4905_v44, %v4906_v34 }
 0x1f9   :  { %v4909_v6 = vpop.permute.xlu0 %4908 }
 0x1fa   :  { %v4911_v15 = vunpack.i.h.bf16 %v4909_v6  ;;  %v4910_v16 = vunpack.i.l.bf16 %v4909_v6  ;;  %4265 = vmatmul.mubr.msk.f32.gmra.mrb[20].mxu0 %vm2668_vm9, %v5845_v19 }
 0x1fb   :  { %3887 = vperm.xlu1 %4901, %v3869_v52   ;;  %2775 = vmatprep.mubr.f32.mxu0 %v4966_v3 }
 0x1fc   :  { %v4524_v20 = vpack.c.bf16 %v4911_v15, %v4906_v34  ;;  %v2977_v23 = vsel %vm533_vm1, %v4910_v16, %v4911_v15  ;;  %3882 = vperm.xlu0 %4900, %v3868_v54  }
 0x1fd   :  { %v4526_v28 = vpack.c.bf16 %v2977_v23, %v2976_v17  ;;  %v4914_v32 = vpop.permute.xlu1 %4913 }
 0x1fe   :  { %4266 = vmatmul.mubr.msk.f32.gmra.mrb[22].mxu0 %vm2668_vm9, %v4242_v56  ;;  %4525 = vmatprep.subr.bf16.mxu0 %v4524_v20  ;;  %v4916_v37 = vunpack.i.h.bf16 %v4914_v32  ;;  %v4915_v38 = vunpack.i.l.bf16 %v4914_v32 }
 0x1ff   :  { %4541 = vmatprep.subr.bf16.mxu1 %v4524_v20  ;;  %3897 = vperm.xlu1 %4901, %v3871_v24  }
 0x200   :  { %4543 = vmatpush1.bf16.msra.mxu1 %v4526_v28  ;;  %3892 = vperm.xlu0 %4900, %v3870_v35   ;;  %v2978_v62 = vsel %vm533_vm1, %v4915_v38, %v4916_v37 }
 0x201   :  { %2781 = vmatprep.mubr.f32.mxu0 %v4966_v3  ;;  %v4919_v40 = vpop.permute.xlu0 %4918 }
 0x202   :  { %v4921_v58 = vunpack.i.h.bf16 %v4919_v40  ;;  %v4920_v59 = vunpack.i.l.bf16 %v4919_v40  ;;  %4267 = vmatmul.mubr.msk.f32.gmra.mrb[24].mxu0 %vm2668_vm9, %v4243_v36 }
 0x203   :  { %3907 = vperm.xlu1 %4901, %v3873_v39   ;;  %2787 = vmatprep.mubr.f32.mxu0 %v4966_v3 }
 0x204   :  { %v4528_v22 = vpack.c.bf16 %v4921_v58, %v4916_v37  ;;  %v2979_v0 = vsel %vm533_vm1, %v4920_v59, %v4921_v58  ;;  %3902 = vperm.xlu0 %4900, %v3872_v57   ;;  %v4312_v58 = vld [vmem:[%s6233_s3 + $0xc8] sm:$0xff] }
 0x205   :  { %v4530_v1 = vpack.c.bf16 %v2979_v0, %v2978_v62  ;;  %v4313_v0 = vld [vmem:[%s6233_s3 + $0xd0] sm:$0xff] }
 0x206   :  { %4268 = vmatmul.mubr.msk.f32.gmra.mrb[26].mxu0 %vm2668_vm9, %v4244_v60  ;;  %4545 = vmatprep.subr.bf16.mxu1 %v4528_v22 }
 0x207   :  { %4547 = vmatpush1.bf16.msra.mxu1 %v4530_v1  ;;  %2793 = vmatprep.mubr.f32.mxu0 %v4966_v3 }
 0x208   :  { %3912 = vperm.xlu0 %4900, %v3874_v2   ;;  %4550 = vmatprep.subr.msk.bf16.mxu1 %vm5762_vm7, %v5768_v27  ;;  %v2655_v27 = vld [vmem:[%s6233_s3 + $0x20] sm:$0xff] }
 0x209   :  { %v4315_v2 = vld [vmem:[%s6233_s3 + $0xe0] sm:$0xff] }
 0x20a   :  { %4269 = vmatmul.mubr.msk.f32.gmra.mrb[28].mxu0 %vm2668_vm9, %v4245_v4  ;;  %4327 = vmatmul.mubr.msk.f32.vlgmr.msra.gmra.mrb[16].mxu1 %vm2668_vm9, %v5810_v18 }
 0x20b   :  { %4553 = vmatpush1.bf16.msk.msra.mxu1 %vm5771_vm8, %v5758_v8  ;;  %2799 = vmatprep.mubr.f32.mxu0 %v4966_v3  ;;  %v2651_v8 = vld [vmem:[%s6233_s3] sm:$0xff] }
 0x20c   :  { %4556 = vmatprep.subr.msk.bf16.mxu1 %vm5762_vm7, %v5795_v12  ;;  %3409 = vmatprep.mubr.f32.mxu1 %v4966_v3 }
 0x20e   :  { %4270 = vmatmul.mubr.msk.f32.gmra.mrb[30].mxu0 %vm2668_vm9, %v4246_v7  ;;  %4328 = vmatmul.mubr.msk.f32.gmra.mrb[18].mxu1 %vm2668_vm9, %v5826_v25 }
 0x20f   :  { %4559 = vmatpush1.bf16.msk.msra.mxu1 %vm5771_vm8, %v5790_v10  ;;  %2894 = vmatprep.mubr.f32.mxu0 %v4966_v3 }
 0x210   :  { %3415 = vmatprep.mubr.f32.mxu1 %v4966_v3 }
 0x212   :  { %4287 = vmatmul.mubr.msk.f32.vlgmr.msra.gmra.mrb[16].mxu0 %vm2668_vm9, %v2651_v8  ;;  %4329 = vmatmul.mubr.msk.f32.gmra.mrb[20].mxu1 %vm2668_vm9, %v5845_v19 }
 0x213   :  { %4527 = vmatpush1.bf16.msra.mxu0 %v4526_v28  ;;  %2900 = vmatprep.mubr.f32.mxu0 %v4966_v3  ;;  %v4311_v28 = vld [vmem:[%s6233_s3 + $0xc0] sm:$0xff] }
 0x214   :  { %4529 = vmatprep.subr.bf16.mxu0 %v4528_v22  ;;  %3421 = vmatprep.mubr.f32.mxu1 %v4966_v3 }
 0x216   :  { %4288 = vmatmul.mubr.msk.f32.gmra.mrb[18].mxu0 %vm2668_vm9, %v2652_v30  ;;  %4330 = vmatmul.mubr.msk.f32.gmra.mrb[22].mxu1 %vm2668_vm9, %v4242_v56 }
 0x217   :  { %4531 = vmatpush1.bf16.msra.mxu0 %v4530_v1  ;;  %2906 = vmatprep.mubr.f32.mxu0 %v4966_v3  ;;  %v4314_v1 = vld [vmem:[%s6233_s3 + $0xd8] sm:$0xff] }
 0x218   :  { %3427 = vmatprep.mubr.f32.mxu1 %v4966_v3 }
 0x21a   :  { %4289 = vmatmul.mubr.msk.f32.gmra.mrb[20].mxu0 %vm2668_vm9, %v2653_v21  ;;  %4331 = vmatmul.mubr.msk.f32.gmra.mrb[24].mxu1 %vm2668_vm9, %v4243_v36 }
 0x21b   :  { %2912 = vmatprep.mubr.f32.mxu0 %v4966_v3  ;;  %3433 = vmatprep.mubr.f32.mxu1 %v4966_v3 }
 0x21e   :  { %4290 = vmatmul.mubr.msk.f32.gmra.mrb[22].mxu0 %vm2668_vm9, %v2654_v26  ;;  %4332 = vmatmul.mubr.msk.f32.gmra.mrb[26].mxu1 %vm2668_vm9, %v4244_v60 }
 0x21f   :  { %2918 = vmatprep.mubr.f32.mxu0 %v4966_v3  ;;  %3439 = vmatprep.mubr.f32.mxu1 %v4966_v3 }
 0x222   :  { %4291 = vmatmul.mubr.msk.f32.gmra.mrb[24].mxu0 %vm2668_vm9, %v2655_v27  ;;  %4333 = vmatmul.mubr.msk.f32.gmra.mrb[28].mxu1 %vm2668_vm9, %v4245_v4  ;;  %v4316_v4 = vld [vmem:[%s6233_s3 + $0xe8] sm:$0xff] }
 0x223   :  { %2924 = vmatprep.mubr.f32.mxu0 %v4966_v3  ;;  %3445 = vmatprep.mubr.f32.mxu1 %v4966_v3 }
 0x226   :  { %4292 = vmatmul.mubr.msk.f32.gmra.mrb[26].mxu0 %vm2668_vm9, %v2656_v29  ;;  %4334 = vmatmul.mubr.msk.f32.gmra.mrb[30].mxu1 %vm2668_vm9, %v4246_v7  ;;  %v4317_v7 = vld [vmem:[%s6233_s3 + $0xf0] sm:$0xff] }
 0x227   :  { %2930 = vmatprep.mubr.f32.mxu0 %v4966_v3  ;;  %3516 = vmatprep.mubr.f32.mxu1 %v4966_v3 }
 0x22a   :  { %4293 = vmatmul.mubr.msk.f32.gmra.mrb[28].mxu0 %vm2668_vm9, %v2657_v33  ;;  %4351 = vmatmul.mubr.msk.f32.vlgmr.msra.gmra.mrb[16].mxu1 %vm2668_vm9, %v2651_v8  ;;  %v4318_v8 = vld [vmem:[%s6233_s3 + $0xf8] sm:$0xff] }
 0x22b   :  { %2936 = vmatprep.mubr.f32.mxu0 %v4966_v3  ;;  %3522 = vmatprep.mubr.f32.mxu1 %v4966_v3 }
 0x22e   :  { %4294 = vmatmul.mubr.msk.f32.gmra.mrb[30].mxu0 %vm2668_vm9, %v2658_v41  ;;  %4352 = vmatmul.mubr.msk.f32.gmra.mrb[18].mxu1 %vm2668_vm9, %v2652_v30 }
 0x22f   :  { %3076 = vmatprep.mubr.f32.mxu0 %v4966_v3  ;;  %3528 = vmatprep.mubr.f32.mxu1 %v4966_v3 }
 0x232   :  { %4303 = vmatmul.mubr.msk.f32.vlgmr.msra.gmra.mrb[16].mxu0 %vm2668_vm9, %v5980_v42  ;;  %4353 = vmatmul.mubr.msk.f32.gmra.mrb[20].mxu1 %vm2668_vm9, %v2653_v21 }
 0x233   :  { %3082 = vmatprep.mubr.f32.mxu0 %v4966_v3  ;;  %3534 = vmatprep.mubr.f32.mxu1 %v4966_v3 }
 0x236   :  { %4304 = vmatmul.mubr.msk.f32.gmra.mrb[18].mxu0 %vm2668_vm9, %v5990_v43  ;;  %4354 = vmatmul.mubr.msk.f32.gmra.mrb[22].mxu1 %vm2668_vm9, %v2654_v26 }
 0x237   :  { %3088 = vmatprep.mubr.f32.mxu0 %v4966_v3  ;;  %3540 = vmatprep.mubr.f32.mxu1 %v4966_v3 }
 0x23a   :  { %4305 = vmatmul.mubr.msk.f32.gmra.mrb[20].mxu0 %vm2668_vm9, %v6000_v45  ;;  %4355 = vmatmul.mubr.msk.f32.gmra.mrb[24].mxu1 %vm2668_vm9, %v2655_v27 }
 0x23b   :  { %3094 = vmatprep.mubr.f32.mxu0 %v4966_v3  ;;  %3546 = vmatprep.mubr.f32.mxu1 %v4966_v3 }
 0x23e   :  { %4306 = vmatmul.mubr.msk.f32.gmra.mrb[22].mxu0 %vm2668_vm9, %v6010_v46  ;;  %4356 = vmatmul.mubr.msk.f32.gmra.mrb[26].mxu1 %vm2668_vm9, %v2656_v29 }
 0x23f   :  { %3100 = vmatprep.mubr.f32.mxu0 %v4966_v3  ;;  %3552 = vmatprep.mubr.f32.mxu1 %v4966_v3 }
 0x242   :  { %4307 = vmatmul.mubr.msk.f32.gmra.mrb[24].mxu0 %vm2668_vm9, %v6020_v47  ;;  %4357 = vmatmul.mubr.msk.f32.gmra.mrb[28].mxu1 %vm2668_vm9, %v2657_v33 }
 0x243   :  { %3106 = vmatprep.mubr.f32.mxu0 %v4966_v3  ;;  %3558 = vmatprep.mubr.f32.mxu1 %v4966_v3 }
 0x246   :  { %4308 = vmatmul.mubr.msk.f32.gmra.mrb[26].mxu0 %vm2668_vm9, %v6030_v48  ;;  %4358 = vmatmul.mubr.msk.f32.gmra.mrb[30].mxu1 %vm2668_vm9, %v2658_v41 }
 0x247   :  { %3112 = vmatprep.mubr.f32.mxu0 %v4966_v3  ;;  %3629 = vmatprep.mubr.f32.mxu1 %v4966_v3 }
 0x24a   :  { %4309 = vmatmul.mubr.msk.f32.gmra.mrb[28].mxu0 %vm2668_vm9, %v6040_v49 }
 0x24b   :  { %3118 = vmatprep.mubr.f32.mxu0 %v4966_v3 }
 0x24e   :  { %4310 = vmatmul.mubr.msk.f32.gmra.mrb[30].mxu0 %vm2668_vm9, %v6049_v63 }
 0x24f   :  { %3274 = vmatprep.mubr.f32.mxu0 %v4966_v3 }
 0x255   :  { %v4924_v50 = vpop.permute.xlu1 %4923 }
 0x256   :  { %v4926_v51 = vunpack.i.h.bf16 %v4924_v50  ;;  %v4925_v53 = vunpack.i.l.bf16 %v4924_v50 }
 0x258   :  { %v3174_v10 = vsel %vm533_vm1, %v4925_v53, %v4926_v51 }
 0x259   :  { %v4929_v55 = vpop.permute.xlu0 %4928 }
 0x25a   :  { %v4931_v61 = vunpack.i.h.bf16 %v4929_v55  ;;  %v4930_v9 = vunpack.i.l.bf16 %v4929_v55 }
 0x25c   :  { %v4532_v11 = vpack.c.bf16 %v4931_v61, %v4926_v51  ;;  %v3175_v12 = vsel %vm533_vm1, %v4930_v9, %v4931_v61 }
 0x25d   :  { %v4534_v13 = vpack.c.bf16 %v3175_v12, %v3174_v10  ;;  %v4934_v14 = vpop.permute.xlu1 %4933 }
 0x25e   :  { %4533 = vmatprep.subr.bf16.mxu0 %v4532_v11  ;;  %4561 = vmatprep.subr.bf16.mxu1 %v4532_v11  ;;  %v4936_v18 = vunpack.i.h.bf16 %v4934_v14  ;;  %v4935_v25 = vunpack.i.l.bf16 %v4934_v14 }
 0x25f   :  { %4535 = vmatpush1.bf16.msra.mxu0 %v4534_v13  ;;  %4563 = vmatpush1.bf16.msra.mxu1 %v4534_v13 }
 0x260   :  { %v3176_v6 = vsel %vm533_vm1, %v4935_v25, %v4936_v18  ;;  %v3948_v25 = vld [vmem:[%s6235_s5 + $0x8] sm:$0xff] }
 0x261   :  { %v4944_v5 = vpop.permute.xlu1 %4943 }
 0x262   :  { %v4939_v31 = vpop.permute.xlu0 %4938  ;;  %v4946_v44 = vunpack.i.h.bf16 %v4944_v5  ;;  %v4945_v52 = vunpack.i.l.bf16 %v4944_v5 }
 0x263   :  { %v4941_v19 = vunpack.i.h.bf16 %v4939_v31  ;;  %v4940_v34 = vunpack.i.l.bf16 %v4939_v31 }
 0x264   :  { %v3710_v24 = vsel %vm2512_vm2, %v4945_v52, %v4946_v44 }
 0x265   :  { %v4536_v54 = vpack.c.bf16 %v4941_v19, %v4936_v18  ;;  %v3177_v15 = vsel %vm533_vm1, %v4940_v34, %v4941_v19  ;;  %v4954_v56 = vpop.permute.xlu1 %4953  ;;  %v3947_v34 = vld [vmem:[%s6235_s5] sm:$0xff] }
 0x266   :  { %v4538_v16 = vpack.c.bf16 %v3177_v15, %v3176_v6  ;;  %v4949_v17 = vpop.permute.xlu0 %4948  ;;  %v4956_v32 = vunpack.i.h.bf16 %v4954_v56  ;;  %v4955_v35 = vunpack.i.l.bf16 %v4954_v56 }
 0x267   :  { %v4951_v20 = vunpack.i.h.bf16 %v4949_v17  ;;  %v4950_v23 = vunpack.i.l.bf16 %v4949_v17  ;;  %4537 = vmatprep.subr.bf16.mxu0 %v4536_v54  ;;  %4565 = vmatprep.subr.bf16.mxu1 %v4536_v54 }
 0x268   :  { %4539 = vmatpush1.bf16.msra.mxu0 %v4538_v16  ;;  %4567 = vmatpush1.bf16.msra.mxu1 %v4538_v16  ;;  %v3712_v59 = vsel %vm2512_vm2, %v4955_v35, %v4956_v32  ;;  %v3949_v35 = vld [vmem:[%s6235_s5 + $0x10] sm:$0xff] }
 0x269   :  { %v4568_v36 = vpack.c.bf16 %v4951_v20, %v4946_v44  ;;  %v3711_v37 = vsel %vm2512_vm2, %v4950_v23, %v4951_v20  ;;  %v3950_v20 = vld [vmem:[%s6235_s5 + $0x18] sm:$0xff] }
 0x26a   :  { %v4570_v38 = vpack.c.bf16 %v3711_v37, %v3710_v24  ;;  %v4959_v39 = vpop.permute.xlu0 %4958 }
 0x26b   :  { %v4961_v40 = vunpack.i.h.bf16 %v4959_v39  ;;  %v4960_v57 = vunpack.i.l.bf16 %v4959_v39  ;;  %4319 = vmatmul.mubr.msk.f32.vlgmr.msra.gmra.mrb[16].mxu0 %vm2668_vm9, %v4311_v28  ;;  %4359 = vmatmul.mubr.msk.f32.vlgmr.msra.gmra.mrb[16].mxu1 %vm2668_vm9, %v5980_v42 }
 0x26c   :  { %4569 = vmatprep.subr.bf16.mxu1 %v4568_v36  ;;  %3280 = vmatprep.mubr.f32.mxu0 %v4966_v3 }
 0x26d   :  { %v4572_v60 = vpack.c.bf16 %v4961_v40, %v4956_v32  ;;  %v3713_v62 = vsel %vm2512_vm2, %v4960_v57, %v4961_v40  ;;  %4571 = vmatpush1.bf16.msra.mxu1 %v4570_v38  ;;  %3635 = vmatprep.mubr.f32.mxu1 %v4966_v3 }
 0x26e   :  { %v4574_v22 = vpack.c.bf16 %v3713_v62, %v3712_v59  ;;  %v3952_v62 = vld [vmem:[%s6235_s5 + $0x28] sm:$0xff] }
 0x26f   :  { %4320 = vmatmul.mubr.msk.f32.gmra.mrb[18].mxu0 %vm2668_vm9, %v4312_v58  ;;  %4360 = vmatmul.mubr.msk.f32.gmra.mrb[18].mxu1 %vm2668_vm9, %v5990_v43 }
 0x270   :  { %4573 = vmatprep.subr.bf16.mxu1 %v4572_v60  ;;  %3286 = vmatprep.mubr.f32.mxu0 %v4966_v3 }
 0x271   :  { %4575 = vmatpush1.bf16.msra.mxu1 %v4574_v22  ;;  %3641 = vmatprep.mubr.f32.mxu1 %v4966_v3 }
 0x273   :  { %4321 = vmatmul.mubr.msk.f32.gmra.mrb[20].mxu0 %vm2668_vm9, %v4313_v0  ;;  %4361 = vmatmul.mubr.msk.f32.gmra.mrb[20].mxu1 %vm2668_vm9, %v6000_v45 }
 0x274   :  { %3292 = vmatprep.mubr.f32.mxu0 %v4966_v3  ;;  %3647 = vmatprep.mubr.f32.mxu1 %v4966_v3 }
 0x276   :  { %v3878_v61 = vpop.permute.xlu1 %3877 }
 0x277   :  { %4322 = vmatmul.mubr.msk.f32.gmra.mrb[22].mxu0 %vm2668_vm9, %v4314_v1  ;;  %4362 = vmatmul.mubr.msk.f32.gmra.mrb[22].mxu1 %vm2668_vm9, %v6010_v46 }
 0x278   :  { %3298 = vmatprep.mubr.f32.mxu0 %v4966_v3  ;;  %3653 = vmatprep.mubr.f32.mxu1 %v4966_v3 }
 0x27a   :  { %v3888_v23 = vpop.permute.xlu1 %3887 }
 0x27b   :  { %4323 = vmatmul.mubr.msk.f32.gmra.mrb[24].mxu0 %vm2668_vm9, %v4315_v2  ;;  %4363 = vmatmul.mubr.msk.f32.gmra.mrb[24].mxu1 %vm2668_vm9, %v6020_v47  ;;  %v3883_v5 = vpop.permute.xlu0 %3882 }
 0x27c   :  { %3304 = vmatprep.mubr.f32.mxu0 %v4966_v3  ;;  %3659 = vmatprep.mubr.f32.mxu1 %v4966_v3 }
 0x27f   :  { %4324 = vmatmul.mubr.msk.f32.gmra.mrb[26].mxu0 %vm2668_vm9, %v4316_v4  ;;  %4364 = vmatmul.mubr.msk.f32.gmra.mrb[26].mxu1 %vm2668_vm9, %v6030_v48  ;;  %v3893_v22 = vpop.permute.xlu0 %3892 }
 0x280   :  { %3310 = vmatprep.mubr.f32.mxu0 %v4966_v3  ;;  %3665 = vmatprep.mubr.f32.mxu1 %v4966_v3 }
 0x283   :  { %4325 = vmatmul.mubr.msk.f32.gmra.mrb[28].mxu0 %vm2668_vm9, %v4317_v7  ;;  %4365 = vmatmul.mubr.msk.f32.gmra.mrb[28].mxu1 %vm2668_vm9, %v6040_v49 }
 0x284   :  { %3316 = vmatprep.mubr.f32.mxu0 %v4966_v3  ;;  %3671 = vmatprep.mubr.f32.mxu1 %v4966_v3 }
 0x287   :  { %4326 = vmatmul.mubr.msk.f32.gmra.mrb[30].mxu0 %vm2668_vm9, %v4318_v8  ;;  %4366 = vmatmul.mubr.msk.f32.gmra.mrb[30].mxu1 %vm2668_vm9, %v6049_v63 }
 0x288   :  { %3786 = vmatprep.mubr.f32.mxu1 %v4966_v3  ;;  %4401 = vmatprep.mubr.msk.f32.mxu0 %vm4971_vm11, %v4966_v3 }
 0x28b   :  { %4367 = vmatmul.mubr.msk.f32.vlgmr.msra.gmra.mrb[16].mxu1 %vm2668_vm9, %v4311_v28 }
 0x28c   :  { %3792 = vmatprep.mubr.f32.mxu1 %v4966_v3 }
 0x28f   :  { %4368 = vmatmul.mubr.msk.f32.gmra.mrb[18].mxu1 %vm2668_vm9, %v4312_v58 }
 0x290   :  { %3798 = vmatprep.mubr.f32.mxu1 %v4966_v3 }
 0x293   :  { %4369 = vmatmul.mubr.msk.f32.gmra.mrb[20].mxu1 %vm2668_vm9, %v4313_v0 }
 0x294   :  { %3804 = vmatprep.mubr.f32.mxu1 %v4966_v3 }
 0x297   :  { %4370 = vmatmul.mubr.msk.f32.gmra.mrb[22].mxu1 %vm2668_vm9, %v4314_v1 }
 0x298   :  { %3810 = vmatprep.mubr.f32.mxu1 %v4966_v3 }
 0x29b   :  { %4371 = vmatmul.mubr.msk.f32.gmra.mrb[24].mxu1 %vm2668_vm9, %v4315_v2 }
 0x29c   :  { %3816 = vmatprep.mubr.f32.mxu1 %v4966_v3 }
 0x29f   :  { %4372 = vmatmul.mubr.msk.f32.gmra.mrb[26].mxu1 %vm2668_vm9, %v4316_v4  ;;  %v3951_v4 = vld [vmem:[%s6235_s5 + $0x20] sm:$0xff] }
 0x2a0   :  { %3822 = vmatprep.mubr.f32.mxu1 %v4966_v3 }
 0x2a3   :  { %4373 = vmatmul.mubr.msk.f32.gmra.mrb[28].mxu1 %vm2668_vm9, %v4317_v7 }
 0x2a4   :  { %3828 = vmatprep.mubr.f32.mxu1 %v4966_v3  ;;  %v4012_v3 = vld [vmem:[%s6236_s6] sm:$0xff] }
 0x2a7   :  { %4374 = vmatmul.mubr.msk.f32.gmra.mrb[30].mxu1 %vm2668_vm9, %v4318_v8 }
 0x33e   :  { %v3276_v30 = vpop.f32.mrb[16].mxu0 }
 0x33f   :  { %v3278_v21 = vpop.f32.mrb[17].mxu0 }
 0x342   :  { %v3282_v26 = vpop.f32.mrb[18].mxu0 }
 0x343   :  { %v3284_v27 = vpop.f32.mrb[19].mxu0 }
 0x346   :  { %v3288_v29 = vpop.f32.mrb[20].mxu0 }
 0x347   :  { %v3290_v33 = vpop.f32.mrb[21].mxu0 }
 0x34a   :  { %v3294_v41 = vpop.f32.mrb[22].mxu0 }
 0x34b   :  { %v3296_v42 = vpop.f32.mrb[23].mxu0 }
 0x34e   :  { %v6140_v43 = vpop.f32.mrb[24].mxu0 }
 0x34f   :  { %v6142_v45 = vpop.f32.mrb[25].mxu0 }
 0x352   :  { %v6144_v46 = vpop.f32.mrb[26].mxu0 }
 0x353   :  { %v6146_v47 = vpop.f32.mrb[27].mxu0 }
 0x356   :  { %v6148_v48 = vpop.f32.mrb[28].mxu0 }
 0x357   :  { %v6150_v49 = vpop.f32.mrb[29].mxu0 }
 0x35a   :  { %v6152_v63 = vpop.f32.mrb[30].mxu0 }
 0x35b   :  { %v6154_v50 = vpop.f32.mrb[31].mxu0 }
 0x35e   :  { %v3788_v51 = vpop.f32.mrb[16].mxu1 }
 0x35f   :  { %v3851_v53 = vmax.f32 %v3276_v30, %v3788_v51  ;;  %v3790_v55 = vpop.f32.mrb[17].mxu1  ;;  %v3898_v51 = vpop.permute.xlu1 %3897 }
 0x360   :  { %v3852_v9 = vmax.f32 %v3278_v21, %v3790_v55 }
 0x361   :  { %v3915_v10 = vadd.f32 %v3878_v61, %v3851_v53 }
 0x362   :  { %v3916_v11 = vadd.f32 %v3878_v61, %v3852_v9  ;;  %v3794_v12 = vpop.f32.mrb[18].mxu1  ;;  %v3953_v9 = vld [vmem:[%s6235_s5 + $0x30] sm:$0xff] }
 0x363   :  { %v3931_v13 = vmax.f32 %v3915_v10, 0.0  ;;  %v3853_v14 = vmax.f32 %v3282_v26, %v3794_v12  ;;  %v3796_v18 = vpop.f32.mrb[19].mxu1 }
 0x364   :  { %v3932_v31 = vmax.f32 %v3916_v11, 0.0  ;;  %v3854_v19 = vmax.f32 %v3284_v27, %v3796_v18 }
 0x365   :  { %v3917_v44 = vadd.f32 %v3883_v5, %v3853_v14  ;;  %v3963_v17 = vmul.f32 %v3947_v34, %v3931_v13 }
 0x366   :  { %v3918_v52 = vadd.f32 %v3883_v5, %v3854_v19  ;;  %v3800_v6 = vpop.f32.mrb[20].mxu1  ;;  %v3964_v54 = vmul.f32 %v3948_v25, %v3932_v31  ;;  %v3903_v31 = vpop.permute.xlu0 %3902 }
 0x367   :  { %v3933_v15 = vmax.f32 %v3917_v44, 0.0  ;;  %v3855_v16 = vmax.f32 %v3288_v29, %v3800_v6  ;;  %v3802_v56 = vpop.f32.mrb[21].mxu1 }
 0x368   :  { %v3934_v24 = vmax.f32 %v3918_v52, 0.0  ;;  %v3856_v28 = vmax.f32 %v3290_v33, %v3802_v56  ;;  %v3980_v32 = vsel %vm3979_vm10, %v3964_v54, 0.0  ;;  %v3955_v52 = vld [vmem:[%s6235_s5 + $0x40] sm:$0xff] }
 0x369   :  { %v3919_v36 = vadd.f32 %v3888_v23, %v3855_v16  ;;  %v3981_v37 = vadd.f32 %v3980_v32, %v3963_v17  ;;  %v3965_v60 = vmul.f32 %v3949_v35, %v3933_v15 }
 0x36a   :  { %v3920_v38 = vadd.f32 %v3888_v23, %v3856_v28  ;;  %v3806_v39 = vpop.f32.mrb[22].mxu1  ;;  %v3966_v40 = vmul.f32 %v3950_v20, %v3934_v24  ;;  %v3908_v24 = vpop.permute.xlu1 %3907 }
 0x36b   :  { %v3935_v57 = vmax.f32 %v3919_v36, 0.0  ;;  %v3857_v58 = vmax.f32 %v3294_v41, %v3806_v39  ;;  %v3808_v59 = vpop.f32.mrb[23].mxu1  ;;  %3982 = vadd.xlane.f32.xlu1 %v3981_v37  ;;  %v3957_v36 = vld [vmem:[%s6235_s5 + $0x50] sm:$0xff] }
 0x36c   :  { %v3936_v0 = vmax.f32 %v3920_v38, 0.0  ;;  %v3858_v1 = vmax.f32 %v3296_v42, %v3808_v59  ;;  %v3984_v2 = vsel %vm3979_vm10, %v3966_v40, 0.0  ;;  %v3954_v42 = vld [vmem:[%s6235_s5 + $0x38] sm:$0xff] }
 0x36d   :  { %v3921_v7 = vadd.f32 %v3893_v22, %v3857_v58  ;;  %v3985_v8 = vadd.f32 %v3984_v2, %v3965_v60  ;;  %v3967_v41 = vmul.f32 %v3951_v4, %v3935_v57  ;;  %v3959_v2 = vld [vmem:[%s6235_s5 + $0x60] sm:$0xff] }
 0x36e   :  { %v3922_v30 = vadd.f32 %v3893_v22, %v3858_v1  ;;  %v3812_v21 = vpop.f32.mrb[24].mxu1  ;;  %v3968_v26 = vmul.f32 %v3952_v62, %v3936_v0  ;;  %v3913_v62 = vpop.permute.xlu0 %3912 }
 0x36f   :  { %v3937_v27 = vmax.f32 %v3921_v7, 0.0  ;;  %v3859_v29 = vmax.f32 %v6140_v43, %v3812_v21  ;;  %v3814_v33 = vpop.f32.mrb[25].mxu1  ;;  %3986 = vadd.xlane.f32.xlu0 %v3985_v8 }
 0x370   :  { %v3938_v53 = vmax.f32 %v3922_v30, 0.0  ;;  %v3860_v55 = vmax.f32 %v6142_v45, %v3814_v33  ;;  %v3988_v61 = vsel %vm3979_vm10, %v3968_v26, 0.0  ;;  %v3956_v45 = vld [vmem:[%s6235_s5 + $0x48] sm:$0xff]  ;;  %v4970_v30 = vmov 0.0|0.0   ;;  %v3961_v33 = vld [vmem:[%s6235_s5 + $0x70] sm:$0xff] }
 0x371   :  { %v3923_v10 = vadd.f32 %v3898_v51, %v3859_v29  ;;  %v3989_v11 = vadd.f32 %v3988_v61, %v3967_v41  ;;  %v3969_v5 = vmul.f32 %v3953_v9, %v3937_v27  ;;  %4576 = vmatprep.subr.bf16.mxu0 %v4970_v30  ;;  %v3962_v27 = vld [vmem:[%s6235_s5 + $0x78] sm:$0xff] }
 0x372   :  { %v3924_v43 = vadd.f32 %v3898_v51, %v3860_v55  ;;  %v3818_v12 = vpop.f32.mrb[26].mxu1  ;;  %v3970_v13 = vmul.f32 %v3954_v42, %v3938_v53 }
 0x373   :  { %v3939_v14 = vmax.f32 %v3923_v10, 0.0  ;;  %v3861_v18 = vmax.f32 %v6144_v46, %v3818_v12  ;;  %v3820_v25 = vpop.f32.mrb[27].mxu1  ;;  %3990 = vadd.xlane.f32.xlu0 %v3989_v11 }
 0x374   :  { %v3940_v19 = vmax.f32 %v3924_v43, 0.0  ;;  %v3862_v34 = vmax.f32 %v6146_v47, %v3820_v25  ;;  %v3992_v44 = vsel %vm3979_vm10, %v3970_v13, 0.0  ;;  %v3958_v47 = vld [vmem:[%s6235_s5 + $0x58] sm:$0xff] }
 0x375   :  { %v3925_v6 = vadd.f32 %v3903_v31, %v3861_v18  ;;  %v3993_v54 = vadd.f32 %v3992_v44, %v3969_v5  ;;  %v3971_v23 = vmul.f32 %v3955_v52, %v3939_v14 }
 0x376   :  { %v3926_v46 = vadd.f32 %v3903_v31, %v3862_v34  ;;  %v3824_v15 = vpop.f32.mrb[28].mxu1  ;;  %v3972_v16 = vmul.f32 %v3956_v45, %v3940_v19  ;;  %v4014_v31 = vstv %s6237_s7 }
 0x377   :  { %v3941_v56 = vmax.f32 %v3925_v6, 0.0  ;;  %v3863_v17 = vmax.f32 %v6148_v48, %v3824_v15  ;;  %v3826_v20 = vpop.f32.mrb[29].mxu1  ;;  %3994 = vadd.xlane.f32.xlu1 %v3993_v54 }
 0x378   :  { %v3942_v28 = vmax.f32 %v3926_v46, 0.0  ;;  %v3864_v32 = vmax.f32 %v6150_v49, %v3826_v20  ;;  %v3996_v35 = vsel %vm3979_vm10, %v3972_v16, 0.0  ;;  %v3960_v49 = vld [vmem:[%s6235_s5 + $0x68] sm:$0xff] }
 0x379   :  { %v3927_v37 = vadd.f32 %v3908_v24, %v3863_v17  ;;  %v3997_v38 = vadd.f32 %v3996_v35, %v3971_v23  ;;  %v3973_v60 = vmul.f32 %v3957_v36, %v3941_v56 }
 0x37a   :  { %v3928_v48 = vadd.f32 %v3908_v24, %v3864_v32  ;;  %v3830_v39 = vpop.f32.mrb[30].mxu1  ;;  %v3974_v40 = vmul.f32 %v3958_v47, %v3942_v28 }
 0x37b   :  { %v3943_v57 = vmax.f32 %v3927_v37, 0.0  ;;  %v3865_v58 = vmax.f32 %v6152_v63, %v3830_v39  ;;  %v3832_v59 = vpop.f32.mrb[31].mxu1  ;;  %3998 = vadd.xlane.f32.xlu0 %v3997_v38 }
 0x37c   :  { %v3944_v22 = vmax.f32 %v3928_v48, 0.0  ;;  %v3866_v0 = vmax.f32 %v6154_v50, %v3832_v59  ;;  %v4000_v1 = vsel %vm3979_vm10, %v3974_v40, 0.0 }
 0x37d   :  { %v3929_v4 = vadd.f32 %v3913_v62, %v3865_v58  ;;  %v4001_v7 = vadd.f32 %v4000_v1, %v3973_v60  ;;  %v3975_v26 = vmul.f32 %v3959_v2, %v3943_v57 }
 0x37e   :  { %v3930_v63 = vadd.f32 %v3913_v62, %v3866_v0  ;;  %v3976_v8 = vmul.f32 %v3960_v49, %v3944_v22 }
 0x37f   :  { %v3945_v21 = vmax.f32 %v3929_v4, 0.0  ;;  %4002 = vadd.xlane.f32.xlu1 %v4001_v7 }
 0x380   :  { %v3946_v50 = vmax.f32 %v3930_v63, 0.0  ;;  %v4004_v29 = vsel %vm3979_vm10, %v3976_v8, 0.0 }
 0x381   :  { %v4005_v41 = vadd.f32 %v4004_v29, %v3975_v26  ;;  %v3977_v51 = vmul.f32 %v3961_v33, %v3945_v21 }
 0x382   :  { %v3978_v42 = vmul.f32 %v3962_v27, %v3946_v50 }
 0x383   :  { %4006 = vadd.xlane.f32.xlu0 %v4005_v41 }
 0x384   :  { %v4008_v53 = vsel %vm3979_vm10, %v3978_v42, 0.0 }
 0x385   :  { %v4009_v55 = vadd.f32 %v4008_v53, %v3977_v51 }
 0x387   :  { %4010 = vadd.xlane.f32.xlu1 %v4009_v55 }
 0x3f8   :  { %v3983_v61 = vpop.xlane.xlu1 %3982 }
 0x3fc   :  { %v3987_v9 = vpop.xlane.xlu0 %3986 }
 0x3fd   :  { %v4577_v10 = vpack.c.bf16 %v3987_v9, %v3983_v61 }
 0x3ff   :  { %4578 = vmatpush3.bf16.msra.mxu0 %v4577_v10 }
 0x400   :  { %4579 = vmatprep.subr.bf16.mxu0 %v4970_v30  ;;  %v3991_v11 = vpop.xlane.xlu0 %3990 }
 0x404   :  { %v3995_v43 = vpop.xlane.xlu1 %3994 }
 0x405   :  { %v4580_v12 = vpack.c.bf16 %v3995_v43, %v3991_v11 }
 0x407   :  { %4581 = vmatpush3.bf16.msra.mxu0 %v4580_v12 }
 0x408   :  { %4582 = vmatprep.subr.bf16.mxu0 %v4970_v30  ;;  %v3999_v13 = vpop.xlane.xlu0 %3998 }
 0x40c   :  { %v4003_v14 = vpop.xlane.xlu1 %4002 }
 0x40d   :  { %v4583_v18 = vpack.c.bf16 %v4003_v14, %v3999_v13 }
 0x40f   :  { %4584 = vmatpush3.bf16.msra.mxu0 %v4583_v18 }
 0x410   :  { %4585 = vmatprep.subr.bf16.mxu0 %v4970_v30  ;;  %v4007_v25 = vpop.xlane.xlu0 %4006 }
 0x414   :  { %v4011_v5 = vpop.xlane.xlu1 %4010 }
 0x415   :  { %v4586_v45 = vpack.c.bf16 %v4011_v5, %v4007_v25 }
 0x417   :  { %4587 = vmatpush3.bf16.msra.mxu0 %v4586_v45 }
 0x41a   :  { %4402 = vmatmul.mubr.msk.f32.vlgmr.msra.gmra.mrb[32].mxu0 %vm4015_vm12, %v4012_v3 }
 0x4ed   :  { %v4085_v19 = vpop.f32.mrb[32].mxu0 }
 0x4ee   :  { %v4086_v34 = vadd.f32 %v4085_v19, %v4014_v31  ;;  %v4403_v44 = vpop.f32.mrb[33].mxu0 }
 0x4f0   :  { %v4089_v52 = vand.u32 2147483647, %v4086_v34  ;;  %vm4093_vm14 = vcmp.ge.f32.partialorder %v4086_v34, 0.0 }
 0x4f2   :  { %v4090_v6 = vsub.f32 0.0, %v4089_v52 }
 0x4f4   :  { %v4091_v54 = vmul.f32 1.442695, %v4090_v6 }
 0x4f6   :  { %4962 = vpow2.f32 %v4091_v54 }
 0x500   :  { %v4963_v46 = vpop.eup %4962 }
 0x501   :  { %v4094_v15 = vadd.f32 1.0, %v4963_v46 }
 0x503   :  { %4964 = vrcp.f32 %v4094_v15 }
 0x50d   :  { %v4965_v16 = vpop.eup %4964 }
 0x50e   :  { %v4097_v56 = vmul.f32 %v4965_v16, %v4963_v46 }
 0x510   :  { %v4098_v17 = vsel %vm4093_vm14, %v4965_v16, %v4097_v56 }
 0x511   :  { %4100 = vst.msk [vmem:[%s6238_s8] sm:$0xff] %vm4099_vm13, %v4098_v17 }

</bundles_post_ra>
